<compile_context>
chip_gen: v7x
topology: tpu7x:2x2x1
jax: 0.10.0
libtpu: 0.0.40
codegen_flags: <defaults>
</compile_context>

<pallas_src>
import functools

import jax
import jax.numpy as jnp
from jax.experimental import pallas as pl
from jax.experimental.pallas import tpu as pltpu

EPS = 1e-6  # LayerNorm2d eps (NAFNet default)

# rows of the packed parameter table (pvec):
#   0..8 : depthwise 3x3 taps (row-major kh*3+kw), halves a|b in lanes [0:Cp)|[Cp:2Cp)
#   9    : depthwise bias
#   10,11: ln1 weight, bias            (lanes [0:Cp))
#   12   : conv1 bias (2Cp)
#   13   : sca bias                    14: conv3 bias
#   15,16: ln2 weight, bias
#   17   : conv4 bias (2Cp)            18: conv5 bias
#   19   : beta                        20: gamma
_PVEC_ROWS = 24


def _channel_layernorm(x, w, b, cmask, inv_c):
    """LayerNorm2d: per-pixel statistics over the true C channels."""
    mu = jnp.sum(x, axis=-1, keepdims=True) * inv_c
    xc = (x - mu) * cmask
    var = jnp.sum(xc * xc, axis=-1, keepdims=True) * inv_c
    return xc * jax.lax.rsqrt(var + EPS) * w + b


def _nafblock_pass1_kernel(xa_ref, xc_ref, xb_ref, pv_ref, w1_ref,
                           hg_ref, pool_ref, *, H, W, C, Cp, tile_hw):
    """norm1 -> conv1 -> depthwise3x3 -> SimpleGate; emit gated tile + pool sum."""
    f32 = jnp.float32
    HW = H * W
    t = pl.program_id(1)
    n_ext = tile_hw + 2 * W
    inv_c = 1.0 / C

    lane = jax.lax.broadcasted_iota(jnp.int32, (1, Cp), 1)
    cmask = (lane < C).astype(f32)

    # halo-extended input tile: [row above | tile | row below] -> (n_ext, Cp)
    x_ext = jnp.concatenate([xa_ref[0], xc_ref[0], xb_ref[0]], axis=0).astype(f32)

    # norm1 (computed on the halo rows too; they feed the depthwise conv)
    xn = _channel_layernorm(x_ext, pv_ref[10:11, :Cp], pv_ref[11:12, :Cp],
                            cmask, inv_c)

    # conv1: fused (a|b) 1x1 conv == one bf16 matmul with f32 accumulation
    h = jnp.dot(xn.astype(jnp.bfloat16), w1_ref[...],
                preferred_element_type=f32) + pv_ref[12:13, :]

    # zero rows that lie outside the image (== zero padding of the depthwise conv);
    # uses the *global* flattened pixel index (review correctness concern #3).
    bpos = jax.lax.broadcasted_iota(jnp.int32, (n_ext, 1), 0)
    gidx = t * tile_hw + bpos - W
    h = h * ((gidx >= 0) & (gidx < HW)).astype(f32)

    # column masks are tile-independent because tile_hw % W == 0
    col = bpos % W
    not_left = (col != 0).astype(f32)
    not_right = (col != W - 1).astype(f32)

    e_l = pltpu.roll(h, 1, 0) * not_left          # value at (r, c-1)
    e_r = pltpu.roll(h, n_ext - 1, 0) * not_right  # value at (r, c+1)

    def wd(k):                                     # depthwise tap k, (1, 2Cp)
        return pv_ref[k:k + 1, :]

    T, W2 = tile_hw, 2 * W
    # vertical neighbours are plain (sublane-aligned) row slices of the halo buffer
    acc = (pv_ref[9:10, :]                                               # dw bias
           + wd(0) * e_l[:T] + wd(1) * h[:T] + wd(2) * e_r[:T]           # row above
           + wd(3) * e_l[W:W + T] + wd(4) * h[W:W + T] + wd(5) * e_r[W:W + T]
           + wd(6) * e_l[W2:W2 + T] + wd(7) * h[W2:W2 + T] + wd(8) * e_r[W2:W2 + T])

    hg = acc[:, :Cp] * acc[:, Cp:]                 # SimpleGate

    hg_ref[0] = hg.astype(hg_ref.dtype)            # bf16 tile, re-read in pass 2

    @pl.when(t == 0)
    def _init():
        pool_ref[...] = jnp.zeros_like(pool_ref)

    pool_ref[0] = pool_ref[0] + jnp.sum(hg, axis=0, keepdims=True)


def _nafblock_pass2_kernel(x_ref, hg_ref, pool_ref, pv_ref, wsca_ref,
                           w3_ref, w4_ref, w5_ref, out_ref, *, H, W, C, Cp):
    """SCA -> conv3 -> residual(beta) -> norm2 -> conv4 -> gate -> conv5 -> residual(gamma)."""
    f32 = jnp.float32
    HW = H * W
    inv_c = 1.0 / C

    lane = jax.lax.broadcasted_iota(jnp.int32, (1, Cp), 1)
    cmask = (lane < C).astype(f32)

    x = x_ref[0].astype(f32)                       # (T, Cp) input tile
    hg = hg_ref[0].astype(f32)                     # gated activations from pass 1

    # simplified channel attention: global mean (sum accumulated in pass 1,
    # divided by the true HW) -> 1x1 conv
    pooled = pool_ref[0] * (1.0 / HW)              # (1, Cp) f32
    sca = jnp.dot(pooled.astype(jnp.bfloat16), wsca_ref[...],
                  preferred_element_type=f32) + pv_ref[13:14, :Cp]
    h = hg * sca
    h = jnp.dot(h.astype(jnp.bfloat16), w3_ref[...],
                preferred_element_type=f32) + pv_ref[14:15, :Cp]    # conv3
    y = x + h * pv_ref[19:20, :Cp]                 # dropout1 = Identity

    # FFN branch
    g = _channel_layernorm(y, pv_ref[15:16, :Cp], pv_ref[16:17, :Cp], cmask, inv_c)
    g = jnp.dot(g.astype(jnp.bfloat16), w4_ref[...],
                preferred_element_type=f32) + pv_ref[17:18, :]      # conv4 (fused)
    g = g[:, :Cp] * g[:, Cp:]                      # SimpleGate
    g = jnp.dot(g.astype(jnp.bfloat16), w5_ref[...],
                preferred_element_type=f32) + pv_ref[18:19, :Cp]    # conv5
    out_ref[0] = (y + g * pv_ref[20:21, :Cp]).astype(out_ref.dtype)  # dropout2 = Identity


def _vmem_limit_bytes():
    # v5e/v6e have 128 MiB physical VMEM -> allow big tiles; v7x has 64 MiB.
    try:
        cap = int(getattr(pltpu.get_tpu_info(), "vmem_capacity_bytes",
                          64 * 1024 * 1024))
    except Exception:
        cap = 64 * 1024 * 1024
    if cap >= 100 * 1024 * 1024:
        return 100 * 1024 * 1024
    return 48 * 1024 * 1024


def _pick_tile_rows(H, W, max_tile_hw):
    best = 1
    for d in range(1, H + 1):
        if H % d == 0 and d * W <= max_tile_hw:
            best = d
    return best


def nafblock_pallas(x_nchw, p, *, max_tile_hw=2048):
    B, C, H, W = x_nchw.shape
    # TODO(synk): pad the flattened row length when W is not a multiple of 8.
    assert W % 8 == 0, "image width must be a multiple of 8 sublanes"
    HW = H * W
    Cp = ((C + 127) // 128) * 128
    Cp2 = 2 * Cp
    f32, bf16 = jnp.float32, jnp.bfloat16

    tile_rows = _pick_tile_rows(H, W, max_tile_hw)
    TR = tile_rows                                  # tile size in image rows
    T = tile_rows * W                               # tile size in flattened pixels
    nT = H // tile_rows
    vmem_limit = _vmem_limit_bytes()

    # ---- input: NCHW -> (B, HW, Cp) bf16, then pad T zero rows on both ends so
    # the halo views of the first/last tiles stay in bounds (and pad rows act as
    # the depthwise conv's vertical zero padding, enforced again by the in-kernel
    # row-validity mask).
    x_flat = jnp.transpose(x_nchw, (0, 2, 3, 1)).reshape(B, HW, C)
    x_flat = jnp.pad(x_flat, ((0, 0), (0, 0), (0, Cp - C))).astype(bf16)
    x_ext = jnp.pad(x_flat, ((0, 0), (T, T), (0, 0)))        # (B, HW + 2T, Cp)

    # ---- fused / padded parameters (host side, once per call) ----
    def pad_sq(w):                                  # (C, Cout<=C) -> (Cp, Cp)
        return jnp.pad(w.astype(f32), ((0, Cp - w.shape[0]), (0, Cp - w.shape[1])))

    w1 = jnp.concatenate([pad_sq(p['w1a']), pad_sq(p['w1b'])], axis=1).astype(bf16)
    w4 = jnp.concatenate([pad_sq(p['w4a']), pad_sq(p['w4b'])], axis=1).astype(bf16)
    wsca = pad_sq(p['wsca']).astype(bf16)
    w3 = pad_sq(p['w3']).astype(bf16)
    w5 = pad_sq(p['w5']).astype(bf16)

    def vrow(a_vec, b_vec=None):                    # pack vectors into a (2Cp,) row
        row = jnp.zeros((Cp2,), f32)
        row = row.at[:C].set(a_vec.reshape(-1).astype(f32))
        if b_vec is not None:
            row = row.at[Cp:Cp + C].set(b_vec.reshape(-1).astype(f32))
        return row

    rows = [vrow(p['wdwa'][k, 0], p['wdwb'][k, 0]) for k in range(9)]
    rows.append(vrow(p['bdwa'], p['bdwb']))         # 9
    rows.append(vrow(p['ln1_w']))                   # 10
    rows.append(vrow(p['ln1_b']))                   # 11
    rows.append(vrow(p['b1a'], p['b1b']))           # 12
    rows.append(vrow(p['bsca']))                    # 13
    rows.append(vrow(p['b3']))                      # 14
    rows.append(vrow(p['ln2_w']))                   # 15
    rows.append(vrow(p['ln2_b']))                   # 16
    rows.append(vrow(p['b4a'], p['b4b']))           # 17
    rows.append(vrow(p['b5']))                      # 18
    rows.append(vrow(p['beta']))                    # 19
    rows.append(vrow(p['gamma']))                   # 20
    while len(rows) < _PVEC_ROWS:
        rows.append(jnp.zeros((Cp2,), f32))
    pvec = jnp.stack(rows, axis=0)                  # (24, 2Cp) f32

    grid = (B, nT)

    # -------- pass 1: conv branch up to SimpleGate + SCA pool accumulation --------
    in_specs_1 = [
        pl.BlockSpec((1, W, Cp), lambda b, t: (b, (t + 1) * TR - 1, 0)),  # halo row above
        pl.BlockSpec((1, T, Cp), lambda b, t: (b, t + 1, 0)),             # current tile
        pl.BlockSpec((1, W, Cp), lambda b, t: (b, (t + 2) * TR, 0)),      # halo row below
        pl.BlockSpec(pvec.shape, lambda b, t: (0, 0)),
        pl.BlockSpec(w1.shape, lambda b, t: (0, 0)),
    ]
    out_specs_1 = [
        pl.BlockSpec((1, T, Cp), lambda b, t: (b, t, 0)),    # gated h tiles (bf16)
        pl.BlockSpec((1, 1, Cp), lambda b, t: (b, 0, 0)),    # pool-sum accumulator (f32)
    ]
    h_gate, pooled = pl.pallas_call(
        functools.partial(_nafblock_pass1_kernel, H=H, W=W, C=C, Cp=Cp, tile_hw=T),
        out_shape=(jax.ShapeDtypeStruct((B, HW, Cp), bf16),
                   jax.ShapeDtypeStruct((B, 1, Cp), f32)),
        grid_spec=pltpu.PrefetchScalarGridSpec(
            num_scalar_prefetch=0, grid=grid,
            in_specs=in_specs_1, out_specs=out_specs_1),
        compiler_params=pltpu.CompilerParams(
            dimension_semantics=("parallel", "arbitrary"),
            vmem_limit_bytes=vmem_limit),
    )(x_ext, x_ext, x_ext, pvec, w1)

    # -------- pass 2: SCA / conv3 / residual / FFN --------
    in_specs_2 = [
        pl.BlockSpec((1, T, Cp), lambda b, t: (b, t + 1, 0)),   # x tile (interior of x_ext)
        pl.BlockSpec((1, T, Cp), lambda b, t: (b, t, 0)),       # gated h tile
        pl.BlockSpec((1, 1, Cp), lambda b, t: (b, 0, 0)),       # pool sum
        pl.BlockSpec(pvec.shape, lambda b, t: (0, 0)),
        pl.BlockSpec(wsca.shape, lambda b, t: (0, 0)),
        pl.BlockSpec(w3.shape, lambda b, t: (0, 0)),
        pl.BlockSpec(w4.shape, lambda b, t: (0, 0)),
        pl.BlockSpec(w5.shape, lambda b, t: (0, 0)),
    ]
    out_flat = pl.pallas_call(
        functools.partial(_nafblock_pass2_kernel, H=H, W=W, C=C, Cp=Cp),
        out_shape=jax.ShapeDtypeStruct((B, HW, Cp), bf16),
        grid_spec=pltpu.PrefetchScalarGridSpec(
            num_scalar_prefetch=0, grid=grid,
            in_specs=in_specs_2,
            out_specs=pl.BlockSpec((1, T, Cp), lambda b, t: (b, t, 0))),
        compiler_params=pltpu.CompilerParams(
            dimension_semantics=("parallel", "parallel"),
            vmem_limit_bytes=vmem_limit),
    )(x_ext, h_gate, pooled, pvec, wsca, w3, w4, w5)

    out = out_flat.reshape(B, H, W, Cp)[..., :C]
    return jnp.transpose(out, (0, 3, 1, 2)).astype(x_nchw.dtype)


# ------------------- pure-JAX reference (PyTorch NCHW semantics) -------------------
def nafblock_ref(x, p):
    C = x.shape[1]

    def ln(z, w, b):
        mu = jnp.mean(z, axis=1, keepdims=True)
        var = jnp.mean((z - mu) ** 2, axis=1, keepdims=True)
        return (z - mu) / jnp.sqrt(var + EPS) * w.reshape(1, -1, 1, 1) + b.reshape(1, -1, 1, 1)

    def conv1x1(z, w_mm, b):                       # w_mm: (Cin, Cout)
        w = jnp.transpose(w_mm)[:, :, None, None]
        y = jax.lax.conv_general_dilated(
            z, w, (1, 1), 'VALID',
            dimension_numbers=('NCHW', 'OIHW', 'NCHW'),
            precision=jax.lax.Precision.HIGHEST)
        return y + b.reshape(1, -1, 1, 1)

    def dwconv(z, w9, b):                          # w9: (9, ch)
        ch = z.shape[1]
        w = jnp.transpose(w9.reshape(3, 3, ch), (2, 0, 1))[:, None, :, :]
        y = jax.lax.conv_general_dilated(
            z, w, (1, 1), ((1, 1), (1, 1)),
            dimension_numbers=('NCHW', 'OIHW', 'NCHW'),
            feature_group_count=ch,
            precision=jax.lax.Precision.HIGHEST)
        return y + b.reshape(1, -1, 1, 1)

    w1 = jnp.concatenate([p['w1a'], p['w1b']], axis=1)
    b1 = jnp.concatenate([p['b1a'], p['b1b']], axis=1)
    wdw = jnp.concatenate([p['wdwa'].reshape(9, C), p['wdwb'].reshape(9, C)], axis=1)
    bdw = jnp.concatenate([p['bdwa'], p['bdwb']], axis=1)
    w4 = jnp.concatenate([p['w4a'], p['w4b']], axis=1)
    b4 = jnp.concatenate([p['b4a'], p['b4b']], axis=1)

    h = ln(x, p['ln1_w'][0], p['ln1_b'][0])
    h = conv1x1(h, w1, b1)
    h = dwconv(h, wdw, bdw)
    h1, h2 = jnp.split(h, 2, axis=1)
    h = h1 * h2
    pooled = jnp.mean(h, axis=(2, 3), keepdims=True)
    sca = conv1x1(pooled, p['wsca'], p['bsca'])
    h = h * sca
    h = conv1x1(h, p['w3'], p['b3'])
    y = x + h * p['beta'][0].reshape(1, -1, 1, 1)

    g = ln(y, p['ln2_w'][0], p['ln2_b'][0])
    g = conv1x1(g, w4, b4)
    g1, g2 = jnp.split(g, 2, axis=1)
    g = g1 * g2
    g = conv1x1(g, p['w5'], p['b5'])
    return y + g * p['gamma'][0].reshape(1, -1, 1, 1)


if __name__ == "__main__":
    B, C, H, W = 2, 4, 16, 16

    key = jax.random.PRNGKey(0)
    keys = jax.random.split(key, 32)

    def nrm(k, shape, scale=0.2):
        return scale * jax.random.normal(k, shape, dtype=jnp.float32)

    params = {
        'ln1_w': nrm(keys[0], (1, C)) + 1.0,
        'ln1_b': nrm(keys[1], (1, C)),
        'w1a': nrm(keys[2], (C, C)), 'w1b': nrm(keys[3], (C, C)),
        'b1a': nrm(keys[4], (1, C)), 'b1b': nrm(keys[5], (1, C)),
        'wdwa': nrm(keys[6], (9, 1, C)), 'wdwb': nrm(keys[7], (9, 1, C)),
        'bdwa': nrm(keys[8], (1, C)), 'bdwb': nrm(keys[9], (1, C)),
        'wsca': nrm(keys[10], (C, C)), 'bsca': nrm(keys[11], (1, C)),
        'w3': nrm(keys[12], (C, C)), 'b3': nrm(keys[13], (1, C)),
        'ln2_w': nrm(keys[14], (1, C)) + 1.0,
        'ln2_b': nrm(keys[15], (1, C)),
        'w4a': nrm(keys[16], (C, C)), 'w4b': nrm(keys[17], (C, C)),
        'b4a': nrm(keys[18], (1, C)), 'b4b': nrm(keys[19], (1, C)),
        'w5': nrm(keys[20], (C, C)), 'b5': nrm(keys[21], (1, C)),
        # PyTorch inits beta/gamma to zeros; use nonzero values to exercise the path.
        'beta': nrm(keys[22], (1, C), 0.5),
        'gamma': nrm(keys[23], (1, C), 0.5),
    }

    x = jax.random.normal(keys[24], (B, C, H, W), dtype=jnp.float32)

    # max_tile_hw=64 forces 4 spatial tiles at this small shape so the halo /
    # two-pass SCA path is actually exercised (default 2048 for real resolutions).
    out = jax.block_until_ready(nafblock_pallas(x, params, max_tile_hw=64))
    ref = jax.block_until_ready(nafblock_ref(x, params))

    max_err = float(jnp.max(jnp.abs(out - ref)))
    assert out.shape == (B, C, H, W)
    # Kernel uses bf16 MXU passes and bf16 activations across HBM boundaries
    # (per perf review); reference is fp32 HIGHEST, so tolerance is relaxed.
    assert max_err < 5e-2, f"mismatch vs reference: max abs err = {max_err}"
    print("KERNEL_OK")
</pallas_src>

<mosaic_0001>
module attributes {stable_mosaic.version = 11 : i64} {
  func.func @_nafblock_pass1_kernel(%arg0: i32, %arg1: i32, %arg2: memref<1x16x128xbf16, #tpu.memory_space<vmem>>, %arg3: memref<1x64x128xbf16, #tpu.memory_space<vmem>>, %arg4: memref<1x16x128xbf16, #tpu.memory_space<vmem>>, %arg5: memref<24x256xf32, #tpu.memory_space<vmem>>, %arg6: memref<128x256xbf16, #tpu.memory_space<vmem>>, %arg7: memref<1x64x128xbf16, #tpu.memory_space<vmem>>, %arg8: memref<1x1x128xf32, #tpu.memory_space<vmem>>) attributes {dimension_semantics = [#tpu.dimension_semantics<parallel>, #tpu.dimension_semantics<arbitrary>], iteration_bounds = array<i64: 2, 4>, scalar_prefetch = 0 : i64, scratch_operands = 0 : i64, tpu.core_type = #tpu.core_type<tc>, window_params = [{transform_indices = @transform_0, window_bounds = array<i64: 1, 16, 128>}, {transform_indices = @transform_1, window_bounds = array<i64: 1, 64, 128>}, {transform_indices = @transform_2, window_bounds = array<i64: 1, 16, 128>}, {pipeline_mode = #tpu.pipeline_mode<synchronous>, transform_indices = @transform_3, window_bounds = array<i64: 24, 256>}, {pipeline_mode = #tpu.pipeline_mode<synchronous>, transform_indices = @transform_4, window_bounds = array<i64: 128, 256>}, {transform_indices = @transform_5, window_bounds = array<i64: 1, 64, 128>}, {transform_indices = @transform_6, window_bounds = array<i64: 1, 1, 128>}]} {
    %0 = tpu.iota {dimensions = array<i32: 1>} : vector<1x128xi32>
    %c4_i32 = arith.constant 4 : i32
    %1 = vector.broadcast %c4_i32 : i32 to vector<1x128xi32>
    %2 = arith.cmpi slt, %0, %1 : vector<1x128xi32>
    %3 = arith.extui %2 : vector<1x128xi1> to vector<1x128xi32>
    %4 = arith.sitofp %3 : vector<1x128xi32> to vector<1x128xf32>
    %c0 = arith.constant 0 : index
    %c0_0 = arith.constant 0 : index
    %c0_1 = arith.constant 0 : index
    %5 = vector.load %arg2[%c0, %c0_0, %c0_1] : memref<1x16x128xbf16, #tpu.memory_space<vmem>>, vector<1x16x128xbf16>
    %6 = vector.shape_cast %5 : vector<1x16x128xbf16> to vector<16x128xbf16>
    %c0_2 = arith.constant 0 : index
    %c0_3 = arith.constant 0 : index
    %c0_4 = arith.constant 0 : index
    %7 = vector.load %arg3[%c0_2, %c0_3, %c0_4] : memref<1x64x128xbf16, #tpu.memory_space<vmem>>, vector<1x64x128xbf16>
    %8 = vector.shape_cast %7 : vector<1x64x128xbf16> to vector<64x128xbf16>
    %c0_5 = arith.constant 0 : index
    %c0_6 = arith.constant 0 : index
    %c0_7 = arith.constant 0 : index
    %9 = vector.load %arg4[%c0_5, %c0_6, %c0_7] : memref<1x16x128xbf16, #tpu.memory_space<vmem>>, vector<1x16x128xbf16>
    %10 = vector.shape_cast %9 : vector<1x16x128xbf16> to vector<16x128xbf16>
    %11 = tpu.concatenate %6, %8, %10 in 0 : vector<16x128xbf16>, vector<64x128xbf16>, vector<16x128xbf16> -> vector<96x128xbf16>
    %12 = arith.extf %11 : vector<96x128xbf16> to vector<96x128xf32>
    %c10 = arith.constant 10 : index
    %c0_8 = arith.constant 0 : index
    %13 = vector.load %arg5[%c10, %c0_8] : memref<24x256xf32, #tpu.memory_space<vmem>>, vector<1x128xf32>
    %c11 = arith.constant 11 : index
    %c0_9 = arith.constant 0 : index
    %14 = vector.load %arg5[%c11, %c0_9] : memref<24x256xf32, #tpu.memory_space<vmem>>, vector<1x128xf32>
    %cst = arith.constant dense<0.000000e+00> : vector<96xf32>
    %15 = vector.multi_reduction <add>, %12, %cst [1] : vector<96x128xf32> to vector<96xf32>
    %16 = vector.shape_cast %15 : vector<96xf32> to vector<96x1xf32>
    %cst_10 = arith.constant 2.500000e-01 : f32
    %17 = vector.broadcast %cst_10 : f32 to vector<96x1xf32>
    %18 = arith.mulf %16, %17 : vector<96x1xf32>
    %19 = vector.broadcast %18 : vector<96x1xf32> to vector<96x128xf32>
    %20 = arith.subf %12, %19 : vector<96x128xf32>
    %21 = vector.broadcast %4 : vector<1x128xf32> to vector<96x128xf32>
    %22 = arith.mulf %20, %21 : vector<96x128xf32>
    %23 = arith.mulf %22, %22 : vector<96x128xf32>
    %cst_11 = arith.constant dense<0.000000e+00> : vector<96xf32>
    %24 = vector.multi_reduction <add>, %23, %cst_11 [1] : vector<96x128xf32> to vector<96xf32>
    %25 = vector.shape_cast %24 : vector<96xf32> to vector<96x1xf32>
    %cst_12 = arith.constant 2.500000e-01 : f32
    %26 = vector.broadcast %cst_12 : f32 to vector<96x1xf32>
    %27 = arith.mulf %25, %26 : vector<96x1xf32>
    %cst_13 = arith.constant 9.99999997E-7 : f32
    %28 = vector.broadcast %cst_13 : f32 to vector<96x1xf32>
    %29 = arith.addf %27, %28 : vector<96x1xf32>
    %30 = math.rsqrt %29 : vector<96x1xf32>
    %31 = vector.broadcast %30 : vector<96x1xf32> to vector<96x128xf32>
    %32 = arith.mulf %22, %31 : vector<96x128xf32>
    %33 = vector.broadcast %13 : vector<1x128xf32> to vector<96x128xf32>
    %34 = arith.mulf %32, %33 : vector<96x128xf32>
    %35 = vector.broadcast %14 : vector<1x128xf32> to vector<96x128xf32>
    %36 = arith.addf %34, %35 : vector<96x128xf32>
    %37 = arith.truncf %36 : vector<96x128xf32> to vector<96x128xbf16>
    %c0_14 = arith.constant 0 : index
    %c0_15 = arith.constant 0 : index
    %38 = vector.load %arg6[%c0_14, %c0_15] : memref<128x256xbf16, #tpu.memory_space<vmem>>, vector<128x256xbf16>
    %cst_16 = arith.constant dense<0.000000e+00> : vector<96x256xf32>
    %39 = tpu.matmul %37, %38, %cst_16 {dimension_numbers = #tpu.dot_dimension_numbers<[1], [0], [0], [1], [0, 0, 1, 1], [], []>} : vector<96x128xbf16>, vector<128x256xbf16>, vector<96x256xf32> -> vector<96x256xf32>
    %c12 = arith.constant 12 : index
    %c0_17 = arith.constant 0 : index
    %40 = vector.load %arg5[%c12, %c0_17] : memref<24x256xf32, #tpu.memory_space<vmem>>, vector<1x256xf32>
    %41 = vector.broadcast %40 : vector<1x256xf32> to vector<96x256xf32>
    %42 = arith.addf %39, %41 : vector<96x256xf32>
    %43 = tpu.iota {dimensions = array<i32: 0>} : vector<96x1xi32>
    %c64_i32 = arith.constant 64 : i32
    %44 = arith.muli %arg1, %c64_i32 : i32
    %45 = vector.broadcast %44 : i32 to vector<96x1xi32>
    %46 = arith.addi %45, %43 : vector<96x1xi32>
    %c16_i32 = arith.constant 16 : i32
    %47 = vector.broadcast %c16_i32 : i32 to vector<96x1xi32>
    %48 = arith.subi %46, %47 : vector<96x1xi32>
    %c0_i32 = arith.constant 0 : i32
    %49 = vector.broadcast %c0_i32 : i32 to vector<96x1xi32>
    %50 = arith.cmpi sge, %48, %49 : vector<96x1xi32>
    %c256_i32 = arith.constant 256 : i32
    %51 = vector.broadcast %c256_i32 : i32 to vector<96x1xi32>
    %52 = arith.cmpi slt, %48, %51 : vector<96x1xi32>
    %53 = arith.andi %50, %52 : vector<96x1xi1>
    %54 = arith.extui %53 : vector<96x1xi1> to vector<96x1xi32>
    %55 = arith.sitofp %54 : vector<96x1xi32> to vector<96x1xf32>
    %56 = vector.broadcast %55 : vector<96x1xf32> to vector<96x256xf32>
    %57 = arith.mulf %42, %56 : vector<96x256xf32>
    %c16_i32_18 = arith.constant 16 : i32
    %c0_i32_19 = arith.constant 0 : i32
    %58 = arith.cmpi eq, %c16_i32_18, %c0_i32_19 : i32
    %c1_i32 = arith.constant 1 : i32
    %59 = arith.select %58, %c1_i32, %c16_i32_18 : i32
    %60 = vector.broadcast %59 : i32 to vector<96x1xi32>
    %61 = arith.remsi %43, %60 : vector<96x1xi32>
    %c0_i32_20 = arith.constant 0 : i32
    %62 = vector.broadcast %c0_i32_20 : i32 to vector<96x1xi32>
    %63 = arith.cmpi ne, %61, %62 : vector<96x1xi32>
    %c0_i32_21 = arith.constant 0 : i32
    %64 = vector.broadcast %c0_i32_21 : i32 to vector<96x1xi32>
    %65 = arith.cmpi slt, %61, %64 : vector<96x1xi32>
    %c0_i32_22 = arith.constant 0 : i32
    %66 = arith.cmpi slt, %59, %c0_i32_22 : i32
    %67 = vector.broadcast %66 : i1 to vector<96x1xi1>
    %68 = vector.broadcast %67 : vector<96x1xi1> to vector<96x1xi1>
    %69 = arith.xori %65, %68 : vector<96x1xi1>
    %70 = arith.andi %69, %63 : vector<96x1xi1>
    %71 = vector.broadcast %59 : i32 to vector<96x1xi32>
    %72 = arith.addi %61, %71 : vector<96x1xi32>
    %73 = arith.select %70, %72, %61 : vector<96x1xi1>, vector<96x1xi32>
    %c0_i32_23 = arith.constant 0 : i32
    %74 = vector.broadcast %c0_i32_23 : i32 to vector<96x1xi32>
    %75 = arith.cmpi ne, %73, %74 : vector<96x1xi32>
    %76 = arith.extui %75 : vector<96x1xi1> to vector<96x1xi32>
    %77 = arith.sitofp %76 : vector<96x1xi32> to vector<96x1xf32>
    %c15_i32 = arith.constant 15 : i32
    %78 = vector.broadcast %c15_i32 : i32 to vector<96x1xi32>
    %79 = arith.cmpi ne, %73, %78 : vector<96x1xi32>
    %80 = arith.extui %79 : vector<96x1xi1> to vector<96x1xi32>
    %81 = arith.sitofp %80 : vector<96x1xi32> to vector<96x1xf32>
    %c1_i32_24 = arith.constant 1 : i32
    %82 = tpu.dynamic_rotate %57 by %c1_i32_24 dim 0 : vector<96x256xf32>, i32 -> vector<96x256xf32>
    %83 = vector.broadcast %77 : vector<96x1xf32> to vector<96x256xf32>
    %84 = arith.mulf %82, %83 : vector<96x256xf32>
    %c95_i32 = arith.constant 95 : i32
    %85 = tpu.dynamic_rotate %57 by %c95_i32 dim 0 : vector<96x256xf32>, i32 -> vector<96x256xf32>
    %86 = vector.broadcast %81 : vector<96x1xf32> to vector<96x256xf32>
    %87 = arith.mulf %85, %86 : vector<96x256xf32>
    %c9 = arith.constant 9 : index
    %c0_25 = arith.constant 0 : index
    %88 = vector.load %arg5[%c9, %c0_25] : memref<24x256xf32, #tpu.memory_space<vmem>>, vector<1x256xf32>
    %c0_26 = arith.constant 0 : index
    %c0_27 = arith.constant 0 : index
    %89 = vector.load %arg5[%c0_26, %c0_27] : memref<24x256xf32, #tpu.memory_space<vmem>>, vector<1x256xf32>
    %90 = vector.extract_strided_slice %84 {offsets = [0, 0], sizes = [64, 256], strides = [1, 1]} : vector<96x256xf32> to vector<64x256xf32>
    %91 = vector.broadcast %89 : vector<1x256xf32> to vector<64x256xf32>
    %92 = arith.mulf %91, %90 : vector<64x256xf32>
    %93 = vector.broadcast %88 : vector<1x256xf32> to vector<64x256xf32>
    %94 = arith.addf %93, %92 : vector<64x256xf32>
    %c1 = arith.constant 1 : index
    %c0_28 = arith.constant 0 : index
    %95 = vector.load %arg5[%c1, %c0_28] : memref<24x256xf32, #tpu.memory_space<vmem>>, vector<1x256xf32>
    %96 = vector.extract_strided_slice %57 {offsets = [0, 0], sizes = [64, 256], strides = [1, 1]} : vector<96x256xf32> to vector<64x256xf32>
    %97 = vector.broadcast %95 : vector<1x256xf32> to vector<64x256xf32>
    %98 = arith.mulf %97, %96 : vector<64x256xf32>
    %99 = arith.addf %94, %98 : vector<64x256xf32>
    %c2 = arith.constant 2 : index
    %c0_29 = arith.constant 0 : index
    %100 = vector.load %arg5[%c2, %c0_29] : memref<24x256xf32, #tpu.memory_space<vmem>>, vector<1x256xf32>
    %101 = vector.extract_strided_slice %87 {offsets = [0, 0], sizes = [64, 256], strides = [1, 1]} : vector<96x256xf32> to vector<64x256xf32>
    %102 = vector.broadcast %100 : vector<1x256xf32> to vector<64x256xf32>
    %103 = arith.mulf %102, %101 : vector<64x256xf32>
    %104 = arith.addf %99, %103 : vector<64x256xf32>
    %c3 = arith.constant 3 : index
    %c0_30 = arith.constant 0 : index
    %105 = vector.load %arg5[%c3, %c0_30] : memref<24x256xf32, #tpu.memory_space<vmem>>, vector<1x256xf32>
    %106 = vector.extract_strided_slice %84 {offsets = [16, 0], sizes = [64, 256], strides = [1, 1]} : vector<96x256xf32> to vector<64x256xf32>
    %107 = vector.broadcast %105 : vector<1x256xf32> to vector<64x256xf32>
    %108 = arith.mulf %107, %106 : vector<64x256xf32>
    %109 = arith.addf %104, %108 : vector<64x256xf32>
    %c4 = arith.constant 4 : index
    %c0_31 = arith.constant 0 : index
    %110 = vector.load %arg5[%c4, %c0_31] : memref<24x256xf32, #tpu.memory_space<vmem>>, vector<1x256xf32>
    %111 = vector.extract_strided_slice %57 {offsets = [16, 0], sizes = [64, 256], strides = [1, 1]} : vector<96x256xf32> to vector<64x256xf32>
    %112 = vector.broadcast %110 : vector<1x256xf32> to vector<64x256xf32>
    %113 = arith.mulf %112, %111 : vector<64x256xf32>
    %114 = arith.addf %109, %113 : vector<64x256xf32>
    %c5 = arith.constant 5 : index
    %c0_32 = arith.constant 0 : index
    %115 = vector.load %arg5[%c5, %c0_32] : memref<24x256xf32, #tpu.memory_space<vmem>>, vector<1x256xf32>
    %116 = vector.extract_strided_slice %87 {offsets = [16, 0], sizes = [64, 256], strides = [1, 1]} : vector<96x256xf32> to vector<64x256xf32>
    %117 = vector.broadcast %115 : vector<1x256xf32> to vector<64x256xf32>
    %118 = arith.mulf %117, %116 : vector<64x256xf32>
    %119 = arith.addf %114, %118 : vector<64x256xf32>
    %c6 = arith.constant 6 : index
    %c0_33 = arith.constant 0 : index
    %120 = vector.load %arg5[%c6, %c0_33] : memref<24x256xf32, #tpu.memory_space<vmem>>, vector<1x256xf32>
    %121 = vector.extract_strided_slice %84 {offsets = [32, 0], sizes = [64, 256], strides = [1, 1]} : vector<96x256xf32> to vector<64x256xf32>
    %122 = vector.broadcast %120 : vector<1x256xf32> to vector<64x256xf32>
    %123 = arith.mulf %122, %121 : vector<64x256xf32>
    %124 = arith.addf %119, %123 : vector<64x256xf32>
    %c7 = arith.constant 7 : index
    %c0_34 = arith.constant 0 : index
    %125 = vector.load %arg5[%c7, %c0_34] : memref<24x256xf32, #tpu.memory_space<vmem>>, vector<1x256xf32>
    %126 = vector.extract_strided_slice %57 {offsets = [32, 0], sizes = [64, 256], strides = [1, 1]} : vector<96x256xf32> to vector<64x256xf32>
    %127 = vector.broadcast %125 : vector<1x256xf32> to vector<64x256xf32>
    %128 = arith.mulf %127, %126 : vector<64x256xf32>
    %129 = arith.addf %124, %128 : vector<64x256xf32>
    %c8 = arith.constant 8 : index
    %c0_35 = arith.constant 0 : index
    %130 = vector.load %arg5[%c8, %c0_35] : memref<24x256xf32, #tpu.memory_space<vmem>>, vector<1x256xf32>
    %131 = vector.extract_strided_slice %87 {offsets = [32, 0], sizes = [64, 256], strides = [1, 1]} : vector<96x256xf32> to vector<64x256xf32>
    %132 = vector.broadcast %130 : vector<1x256xf32> to vector<64x256xf32>
    %133 = arith.mulf %132, %131 : vector<64x256xf32>
    %134 = arith.addf %129, %133 : vector<64x256xf32>
    %135 = vector.extract_strided_slice %134 {offsets = [0, 0], sizes = [64, 128], strides = [1, 1]} : vector<64x256xf32> to vector<64x128xf32>
    %136 = vector.extract_strided_slice %134 {offsets = [0, 128], sizes = [64, 128], strides = [1, 1]} : vector<64x256xf32> to vector<64x128xf32>
    %137 = arith.mulf %135, %136 : vector<64x128xf32>
    %138 = arith.truncf %137 : vector<64x128xf32> to vector<64x128xbf16>
    %c0_36 = arith.constant 0 : index
    %c0_37 = arith.constant 0 : index
    %c0_38 = arith.constant 0 : index
    %139 = vector.load %arg7[%c0_36, %c0_37, %c0_38] : memref<1x64x128xbf16, #tpu.memory_space<vmem>>, vector<1x64x128xbf16>
    %140 = vector.shape_cast %139 : vector<1x64x128xbf16> to vector<64x128xbf16>
    %141 = vector.shape_cast %138 : vector<64x128xbf16> to vector<1x64x128xbf16>
    tpu.vector_store %arg7[%c0_36, %c0_37, %c0_38], %141 {strides = array<i32>} : memref<1x64x128xbf16, #tpu.memory_space<vmem>>, vector<1x64x128xbf16>,
    %c0_i32_39 = arith.constant 0 : i32
    %142 = arith.cmpi eq, %arg1, %c0_i32_39 : i32
    %143 = arith.extui %142 : i1 to i32
    %c0_i32_40 = arith.constant 0 : i32
    %144 = arith.cmpi ne, %143, %c0_i32_40 : i32
    scf.if %144 {
      %cst_48 = arith.constant 0.000000e+00 : f32
      %153 = vector.broadcast %cst_48 : f32 to vector<1x1x128xf32>
      %c0_49 = arith.constant 0 : index
      %c0_50 = arith.constant 0 : index
      %c0_51 = arith.constant 0 : index
      %154 = vector.load %arg8[%c0_49, %c0_50, %c0_51] : memref<1x1x128xf32, #tpu.memory_space<vmem>>, vector<1x1x128xf32>
      tpu.vector_store %arg8[%c0_49, %c0_50, %c0_51], %153 {strides = array<i32>} : memref<1x1x128xf32, #tpu.memory_space<vmem>>, vector<1x1x128xf32>,
    } else {
    }
    %c0_41 = arith.constant 0 : index
    %c0_42 = arith.constant 0 : index
    %c0_43 = arith.constant 0 : index
    %145 = vector.load %arg8[%c0_41, %c0_42, %c0_43] : memref<1x1x128xf32, #tpu.memory_space<vmem>>, vector<1x1x128xf32>
    %146 = vector.shape_cast %145 : vector<1x1x128xf32> to vector<1x128xf32>
    %cst_44 = arith.constant dense<0.000000e+00> : vector<128xf32>
    %147 = vector.multi_reduction <add>, %137, %cst_44 [0] : vector<64x128xf32> to vector<128xf32>
    %148 = vector.shape_cast %147 : vector<128xf32> to vector<1x128xf32>
    %149 = arith.addf %146, %148 : vector<1x128xf32>
    %c0_45 = arith.constant 0 : index
    %c0_46 = arith.constant 0 : index
    %c0_47 = arith.constant 0 : index
    %150 = vector.load %arg8[%c0_45, %c0_46, %c0_47] : memref<1x1x128xf32, #tpu.memory_space<vmem>>, vector<1x1x128xf32>
    %151 = vector.shape_cast %150 : vector<1x1x128xf32> to vector<1x128xf32>
    %152 = vector.shape_cast %149 : vector<1x128xf32> to vector<1x1x128xf32>
    tpu.vector_store %arg8[%c0_45, %c0_46, %c0_47], %152 {strides = array<i32>} : memref<1x1x128xf32, #tpu.memory_space<vmem>>, vector<1x1x128xf32>,
    return
  }
  func.func @transform_0(%arg0: i32, %arg1: i32) -> (i32, i32, i32) {
    %c1_i32 = arith.constant 1 : i32
    %0 = arith.addi %arg1, %c1_i32 : i32
    %c4_i32 = arith.constant 4 : i32
    %1 = arith.muli %0, %c4_i32 : i32
    %c1_i32_0 = arith.constant 1 : i32
    %2 = arith.subi %1, %c1_i32_0 : i32
    %c0_i32 = arith.constant 0 : i32
    %c0_i32_1 = arith.constant 0 : i32
    return %arg0, %2, %c0_i32 : i32, i32, i32
  }
  func.func @transform_1(%arg0: i32, %arg1: i32) -> (i32, i32, i32) {
    %c1_i32 = arith.constant 1 : i32
    %0 = arith.addi %arg1, %c1_i32 : i32
    %c0_i32 = arith.constant 0 : i32
    %c0_i32_0 = arith.constant 0 : i32
    return %arg0, %0, %c0_i32 : i32, i32, i32
  }
  func.func @transform_2(%arg0: i32, %arg1: i32) -> (i32, i32, i32) {
    %c2_i32 = arith.constant 2 : i32
    %0 = arith.addi %arg1, %c2_i32 : i32
    %c4_i32 = arith.constant 4 : i32
    %1 = arith.muli %0, %c4_i32 : i32
    %c0_i32 = arith.constant 0 : i32
    %c0_i32_0 = arith.constant 0 : i32
    return %arg0, %1, %c0_i32 : i32, i32, i32
  }
  func.func @transform_3(%arg0: i32, %arg1: i32) -> (i32, i32) {
    %c0_i32 = arith.constant 0 : i32
    %c0_i32_0 = arith.constant 0 : i32
    %c0_i32_1 = arith.constant 0 : i32
    return %c0_i32, %c0_i32_0 : i32, i32
  }
  func.func @transform_4(%arg0: i32, %arg1: i32) -> (i32, i32) {
    %c0_i32 = arith.constant 0 : i32
    %c0_i32_0 = arith.constant 0 : i32
    %c0_i32_1 = arith.constant 0 : i32
    return %c0_i32, %c0_i32_0 : i32, i32
  }
  func.func @transform_5(%arg0: i32, %arg1: i32) -> (i32, i32, i32) {
    %c0_i32 = arith.constant 0 : i32
    %c0_i32_0 = arith.constant 0 : i32
    return %arg0, %arg1, %c0_i32 : i32, i32, i32
  }
  func.func @transform_6(%arg0: i32, %arg1: i32) -> (i32, i32, i32) {
    %c0_i32 = arith.constant 0 : i32
    %c0_i32_0 = arith.constant 0 : i32
    %c0_i32_1 = arith.constant 0 : i32
    return %arg0, %c0_i32, %c0_i32_0 : i32, i32, i32
  }
}

</mosaic_0001>

<bundles_post_ra>
// kernel: tpu_custom_call.1
= control target key start
LH: loop header
LB: loop body
LE: loop exit
PB: predicated region body
PF: predicated region fallthrough
CT: control target
= control target key end

     0   :  { %s4883_s0 = inlined_call_operand.hbm [shape: bf16[2,384,128], index: 0, kind: input, shape index: {}]   ;;  %s4884_s1 = inlined_call_operand.hbm [shape: bf16[2,384,128], index: 1, kind: input, shape index: {}]   ;;  %s4885_s2 = inlined_call_operand.hbm [shape: bf16[2,384,128], index: 2, kind: input, shape index: {}]   ;;  %s4886_s3 = inlined_call_operand.hbm [shape: f32[24,256], index: 3, kind: input, shape index: {}]   ;;  %s4887_s4 = inlined_call_operand.hbm [shape: bf16[128,256], index: 4, kind: input, shape index: {}]   ;;  %s4888_s5 = inlined_call_operand.hbm [shape: bf16[2,256,128], index: 5, kind: output, shape index: {0}]   ;;  %s4889_s6 = inlined_call_operand.hbm [shape: f32[2,1,128], index: 6, kind: output, shape index: {1}]  }
   0x1   :  { %4976 = sst [smem:[#allocation118_spill]] %s4883_s0 }
   0x2   :  { %4977 = sst [smem:[#allocation119_spill]] %s4884_s1 }
   0x3   :  { %4978 = sst [smem:[#allocation120_spill]] %s4886_s3 }
   0x4   :  { %4979 = sst [smem:[#allocation121_spill]] %s4887_s4 }
   0x5   :  { %4980 = sst [smem:[#allocation122_spill]] %s4888_s5 }
   0x6   :  { %4981 = sst [smem:[#allocation123_spill]] %s4889_s6 }
   0x7   :  { %12 = vsyncpa [#allocation3], 0 }
   0x8   :  { %14 = vsyncpa [#allocation3 + $0x1], 0 }
   0x9   :  { %15 = vsyncpa [#allocation6], 0 }
   0xa   :  { %17 = vsyncpa [#allocation6 + $0x1], 0 }
   0xb   :  { %18 = vsyncpa [#allocation9], 0 }
   0xc   :  { %19 = vsyncpa [#allocation4], 0 }
   0xd   :  { %21 = vsyncpa [#allocation4 + $0x1], 0 }
   0xe   :  { %22 = vsyncpa [#allocation13], 0 }
   0xf   :  { %24 = vsyncpa [#allocation13 + $0x1], 0  ;;  %s2956_s21 = smov 0   ;;  %s2958_s22 = smov 0  }
  0x10   :  { %s2960_s23 = smov 0   ;;  %s2962_s24 = smov 0  }
  0x11   :  { %s2964_s25 = smov 0   ;;  %s2966_s26 = smov 0  }
  0x12   :  { %s2968_s27 = smov 0   ;;  %s2970_s28 = smov 0  }
  0x13   :  { %s2972_s29 = smov 0   ;;  %s2974_s30 = smov 0  }
  0x14   :  { %s2976_s7 = smov 0   ;;  %s2978_s8 = smov 0  }
  0x15   :  { %s2980_s9 = smov 0   ;;  %s2982_s10 = smov 0  }
  0x16   :  { %s2984_s11 = smov 0   ;;  %s2986_s12 = smov 0  }
  0x17   :  { %s2988_s13 = smov 0   ;;  %s2990_s14 = smov 0  }
  0x18   :  { %s2992_s15 = smov 0   ;;  %s2994_s16 = smov 0  }
  0x19 LB: > { %4982 = sst [smem:[#allocation20_spill]] %s2825_s21  ;;  %s3057_s17 = sadd.s32 4294967295, %s2901_s16   ;;  %s2901_s16 = sphi %s2994_s16, %s30_s16   ;;  %s2897_s15 = sphi %s2992_s15, %s5364_s15   ;;  %s2893_s14 = sphi %s2990_s14, %s5363_s14   ;;  %s2889_s13 = sphi %s2988_s13, %s5362_s13   ;;  %s2885_s12 = sphi %s2986_s12, %s5349_s12   ;;  %s2881_s11 = sphi %s2984_s11, %s5361_s11   ;;  %s2877_s10 = sphi %s2982_s10, %s5360_s10   ;;  %s2873_s9 = sphi %s2980_s9, %s5347_s9   ;;  %s2869_s8 = sphi %s2978_s8, %s5359_s8   ;;  %s2865_s7 = sphi %s2976_s7, %s5358_s7   ;;  %s2861_s30 = sphi %s2974_s30, %s5344_s30   ;;  %s2857_s29 = sphi %s2972_s29, %s5357_s29   ;;  %s2853_s28 = sphi %s2970_s28, %s5343_s28   ;;  %s2849_s27 = sphi %s2968_s27, %s5356_s27   ;;  %s2845_s26 = sphi %s2966_s26, %s5355_s26   ;;  %s2841_s25 = sphi %s2964_s25, %s5354_s25   ;;  %s2837_s24 = sphi %s2962_s24, %s5340_s24   ;;  %s2833_s23 = sphi %s2960_s23, %s5352_s23   ;;  %s2829_s22 = sphi %s2958_s22, %s5350_s22   ;;  %s2825_s21 = sphi %s2956_s21, %s5338_s21  }
  0x1a   : > { %4983 = sst [smem:[#allocation21_spill]] %s2829_s22  ;;  %s2077_s18 = sadd.s32 4294967294, %s2901_s16  }
  0x1b   : > { %4984 = sst [smem:[#allocation22_spill]] %s2837_s24  ;;  %p4904_p0 = scmp.eq.s32.totalorder %s3057_s17, 0 }
  0x1c   : > { %4985 = sst [smem:[#allocation23_spill]] %s2841_s25  ;;  %p199_p1 = scmp.ne.s32.totalorder %s2845_s26, %s2841_s25 }
  0x1d   : > { %4986 = sst [smem:[#allocation24_spill]] %s2849_s27  ;;  %p200_p2 = scmp.eq.s32.totalorder %s3057_s17, 7 }
  0x1e   : > { %4987 = sst [smem:[#allocation25_spill]] %s2853_s28  ;;  %p205_p3 = scmp.ne.s32.totalorder %s2841_s25, %s2837_s24 }
  0x1f   : > { %4988 = sst [smem:[#allocation26_spill]] %s2857_s29  ;;  %p206_p4 = scmp.eq.s32.totalorder %s2077_s18, 7 }
  0x20   : > { %4989 = sst [smem:[#allocation27_spill]] %s2865_s7  ;;  %p3067_p5 = por %p200_p2, %p199_p1 }
  0x21   : > { %4990 = sst [smem:[#allocation28_spill]] %s2869_s8  ;;  %p225_p6 = scmp.ne.s32.totalorder %s2833_s23, %s2829_s22 }
  0x22   : > { %4991 = sst [smem:[#allocation29_spill]] %s2873_s9  ;;  %p3073_p7 = por %p206_p4, %p205_p3 }
  0x23   : > { %4992 = sst [smem:[#allocation30_spill]] %s2877_s10  ;;  %p231_p8 = scmp.ne.s32.totalorder %s2829_s22, %s2825_s21 }
  0x24   : > { %4993 = sst [smem:[#allocation31_spill]] %s2885_s12  ;;  %p3079_p9 = por %p225_p6, %p200_p2 }
  0x25   : > { %4994 = sst [smem:[#allocation32_spill]] %s2889_s13  ;;  %p2084_p10 = scmp.ge.s32.totalorder %s2901_s16, 1 }
  0x26   : > { %4995 = sst [smem:[#allocation33_spill]] %s2893_s14  ;;  %p3084_p11 = por %p231_p8, %p206_p4 }
  0x27   : > { %4996 = sst [smem:[#allocation34_spill]] %s3057_s17  ;;  %p239_p12 = scmp.lt.s32.totalorder %s2901_s16, 9 }
  0x28   : > { %s4997_s20 = scalar_select %p3067_p5, 1, 0 }
  0x29   : > { %s4999_s6 = scalar_select %p3073_p7, 1, 0 }
  0x2a   : > { %4998 = sst [smem:[#allocation35_spill]] %s4997_s20  ;;  %p3089_p13 = pnand %p2084_p10, %p239_p12 }
  0x2b   : > { %5000 = sst [smem:[#allocation36_spill]] %s4999_s6  ;;  %s2903_s19 = smov [#allocation8]  }
  0x2c   : > { %s5001_s5 = scalar_select %p3079_p9, 1, 0 }
  0x2d   : > { %s5003_s24 = scalar_select %p3084_p11, 1, 0 }
  0x2e   : > { %5002 = sst [smem:[#allocation37_spill]] %s5001_s5  ;;  %s251_s20 = sshll.u32 %s2903_s19, 4  ;;  %s252_s20 = int_to_ptr.vmem [resolvable:$true] %s251_s20 }
  0x2f   : > { %5004 = sst [smem:[#allocation38_spill]] %s5003_s24  ;;  %p2258_p1 = pneg %p3089_p13 }
  0x30   : > { %s5005_s18 = scalar_select %p3089_p13, 1, 0 }
  0x31   : > { %p3097_p2 = pnand %p2258_p1, %p4904_p0  ;;  %s5008_s3 = sld [smem:[#allocation120_spill]] }
  0x32   : > { %5006 = sst [smem:[#allocation39_spill]] %s5005_s18 }
  0x33   : > { %p4925_p4 = pneg %p3097_p2 }
  0x37   : > { %s2515_s24 = scalar_lea.hbm %s5008_s3, 768 }
  0x38   : > { %p2516_p3 = scmp.ne.s32.totalorder %s5008_s3, %s2515_s24  ;;  %p2522_p10 = scmp.lt.u32.totalorder %s2515_s24, %s5008_s3 }
  0x3a   : > { %p2518_p6 = pnand %p4925_p4, %p2516_p3 }
  0x3c   : > { %p2519_p8 = pneg %p2518_p6 }
  0x3e   : > { %p2524_p12 = pnand %p2522_p10, %p2519_p8 }
  0x40   : > { %2527 = shalt.err (!%p2524_p12)
}
  0x41   : > { %s2528_s5 = scalar_lea.vmem %s252_s20, 768  ;;  %p2536_p7 = scmp.lt.s32.totalorder %s252_s20, %s252_s20 }
  0x42   : > { %p2529_p1 = scmp.ne.s32.totalorder %s252_s20, %s2528_s5  ;;  %p2537_p9 = scmp.lt.s32.totalorder %s2528_s5, %s2528_s5 }
  0x44   : > { %p2531_p0 = pnand %p2529_p1, %p4925_p4  ;;  %p2538_p5 = por %p2537_p9, %p2536_p7 }
  0x46   : > { %p2532_p11 = pneg %p2531_p0 }
  0x48   : > { %p2539_p13 = pnand %p2538_p5, %p2532_p11 }
  0x4a   : > { %2542 = shalt.err (!%p2539_p13)
}
  0x4b   : > { %s2904_s6 = smov 256   ;;  %s2905_s24 = smov 16  }
  0x4c   : > { %2261 = dma.hbm_to_vmem [thread:$0]  (!%p3097_p2), %s5008_s3, 768, %s252_s20, [#allocation9], %s2904_s6, %s2904_s6, %s2905_s24  }
  0x4d   : > { %s39_s13 = sadd.s32 1, %s2893_s14  ;;  %s42_s19 = sadd.s32 1, %s2897_s15 }
  0x4e   : > { %p40_p0 = scmp.ge.s32.totalorder %s39_s13, 4  ;;  %p4924_p5 = scmp.eq.s32.totalorder %s2901_s16, 0 }
  0x4f   : > { %s87_s5 = sadd.s32 1, %s2869_s8  ;;  %p94_p7 = scmp.ne.s32.totalorder %s2869_s8, %s2865_s7 }
  0x50   : > { %s3127_s22 = scalar_select %p40_p0, 0, %s39_s13  }
  0x51   : > { %s5366_s19 = smov (!%p40_p0, %s42_s19), %s2897_s15  ;;  %p3135_p11 = por %p94_p7, %p4924_p5 }
  0x52   : > { %5009 = sst [smem:[#allocation40_spill]] %s3127_s22  ;;  %s5010_s18 = smov %s3127_s22 }
  0x53   : > { %s81_s27 = sadd.s32 1, %s5010_s18  ;;  %p44_p9 = scmp.ge.s32.totalorder %s5366_s19, 2 }
  0x54   : > { %s83_s20 = ssub.s32 %s39_s13, %s81_s27  ;;  %p100_p13 = scmp.ne.s32.totalorder %s2865_s7, %s2861_s30 }
  0x55   : > { %s5368_s19 = smov (%p44_p9, %s5366_s19), 0  ;;  %p5013_p3 = scmp.eq.s32.totalorder %s3057_s17, 0 }
  0x56   : > { %5012 = sst [smem:[#allocation41_spill]] %s5368_s19  ;;  %s185_s27 = ssub.s32 %s2893_s14, %s5010_s18 }
  0x57   : > { %p3145_p6 = por %p100_p13, %p5013_p3  ;;  %s3153_s24 = ssub.s32 %s2897_s15, %s5368_s19 }
  0x58   : > { %s189_s25 = sadd.s32 1, %s2845_s26  ;;  %s84_s30 = sor.u32 %s83_s20, %s3153_s24 }
  0x59   : > { %s5014_s22 = scalar_select %p3145_p6, 1, 0 }
  0x5a   : > { %s186_s12 = sor.u32 %s185_s27, %s3153_s24  ;;  %p85_p8 = scmp.eq.s32.totalorder %s84_s30, 0 }
  0x5b   : > { %5015 = sst [smem:[#allocation42_spill]] %s5014_s22  ;;  %p187_p10 = scmp.eq.s32.totalorder %s186_s12, 0 }
  0x5c   : > { %p213_p12 = scmp.eq.s32.totalorder %s3153_s24, 0  ;;  %p4923_p1 = scmp.lt.s32.totalorder %s2901_s16, 8 }
  0x5d   : > { %s3161_s13 = scalar_select %p85_p8, %s2869_s8, %s87_s5  }
  0x5e   : > { %s3164_s3 = scalar_select %p187_p10, %s2845_s26, %s189_s25  }
  0x5f   : > { %5016 = sst [smem:[#allocation43_spill]] %s3161_s13  ;;  %s5018_s22 = sadd.s32 1, %s2833_s23 }
  0x60   : > { %5017 = sst [smem:[#allocation44_spill]] %s3164_s3  ;;  %s4922_s7 = smul.u32 48, %s2897_s15 }
  0x61   : > { %s3169_s19 = scalar_select %p213_p12, %s2833_s23, %s5018_s22  }
  0x62   : > { %s304_s28 = sand.u32 1, %s2901_s16   ;;  %s306_s29 = sand.u32 1, %s2869_s8  }
  0x63   : > { %5019 = sst [smem:[#allocation45_spill]] %s3169_s19  ;;  %s2093_s0 = sshll.u32 %s306_s29, 5 }
  0x64   : > { %s2094_s17 = sshll.u32 %s2893_s14, 3  ;;  %s308_s30 = scalar_lea.vmem [#allocation5], %s2093_s0 }
  0x65   : > { %s1943_s20 = sadd.s32 %s4922_s7, %s2094_s17  ;;  %s318_s12 = sshll.u32 %s308_s30, 4  ;;  %s3180_s12 = int_to_ptr.vmem [resolvable:$true] %s318_s12 }
  0x66   : > { %s2095_s27 = sshll.u32 %s1943_s20, 6  ;;  %s5020_s1 = sld [smem:[#allocation119_spill]] }
  0x67   : > { %p3188_p0 = pnand %p4923_p1, %p3135_p11  ;;  %s3195_s9 = scalar_lea.hbm %s4885_s2, %s2095_s27 }
  0x68   : > { %s3197_s10 = scalar_lea.sflag [#allocation6], %s304_s28 }
  0x69   : > { %p2545_p9 = pneg %p3188_p0 }
  0x6c   : > { %s1945_s5 = scalar_lea.hbm %s5020_s1, %s2095_s27  ;;  %s2548_s30 = scalar_lea.hbm %s5020_s1, 6144 }
  0x6d   : > { %s3182_s25 = scalar_lea.hbm %s1945_s5, 512  ;;  %s2573_s22 = scalar_lea.hbm %s1945_s5, 1024 }
  0x6e   : > { %p2544_p7 = scmp.ne.s32.totalorder %s3182_s25, %s2573_s22  ;;  %p2549_p3 = scmp.lt.u32.totalorder %s3182_s25, %s5020_s1 }
  0x6f   : > { %p2550_p8 = scmp.lt.u32.totalorder %s2548_s30, %s2573_s22  ;;  %p2552_p12 = scmp.lt.u32.totalorder %s2573_s22, %s3182_s25 }
  0x70   : > { %p2546_p13 = pnand %p2545_p9, %p2544_p7 }
  0x71   : > { %p2551_p10 = por %p2550_p8, %p2549_p3 }
  0x72   : > { %p2547_p11 = pneg %p2546_p13 }
  0x73   : > { %p2553_p1 = por %p2552_p12, %p2551_p10 }
  0x75   : > { %p2554_p5 = pnand %p2553_p1, %p2547_p11 }
  0x77   : > { %2557 = shalt.err (!%p2554_p5)
}
  0x78   : > { %s2558_s28 = scalar_lea.vmem %s3180_s12, 512  ;;  %s2906_s27 = smov [#allocation5]  }
  0x79   : > { %p2559_p7 = scmp.ne.s32.totalorder %s3180_s12, %s2558_s28  ;;  %s2563_s5 = sshll.u32 %s2906_s27, 4  ;;  %s2564_s5 = int_to_ptr.vmem [resolvable:$false] %s2563_s5 }
  0x7a   : > { %s2565_s7 = scalar_lea.vmem %s2564_s5, 1024  ;;  %p2566_p6 = scmp.lt.s32.totalorder %s3180_s12, %s2564_s5 }
  0x7b   : > { %p2561_p13 = pnand %p2559_p7, %p2545_p9  ;;  %p2567_p3 = scmp.lt.s32.totalorder %s2565_s7, %s2558_s28 }
  0x7d   : > { %p2562_p4 = pneg %p2561_p13  ;;  %p2568_p8 = por %p2567_p3, %p2566_p6 }
  0x7f   : > { %p2569_p10 = pnand %p2568_p8, %p2562_p4 }
  0x81   : > { %2572 = shalt.err (!%p2569_p10)
}
  0x82   : > { %s4927_s0 = smov 64   ;;  %s4929_s22 = smov 4  }
  0x83   : > { %2271 = dma.hbm_to_vmem [thread:$0]  (!%p3188_p0), %s3182_s25, 512, %s3180_s12, %s3197_s10, %s4927_s0, %s4927_s0, %s4929_s22  }
  0x84   : > { %s2909_s6 = smov [#allocation10]   ;;  %s5022_s4 = sld [smem:[#allocation121_spill]] }
  0x85   : > { %s264_s20 = sshll.u32 %s2909_s6, 4  ;;  %p5023_p5 = pneg %p3097_p2  ;;  %s265_s20 = int_to_ptr.vmem [resolvable:$true] %s264_s20 }
  0x8a   : > { %s2574_s28 = scalar_lea.hbm %s5022_s4, 2048 }
  0x8b   : > { %p2575_p4 = scmp.ne.s32.totalorder %s5022_s4, %s2574_s28  ;;  %p2581_p9 = scmp.lt.u32.totalorder %s2574_s28, %s5022_s4 }
  0x8d   : > { %p2577_p6 = pnand %p2575_p4, %p5023_p5 }
  0x8f   : > { %p2578_p1 = pneg %p2577_p6 }
  0x91   : > { %p2583_p0 = pnand %p2581_p9, %p2578_p1 }
  0x93   : > { %2586 = shalt.err (!%p2583_p0)
}
  0x94   : > { %s2587_s12 = scalar_lea.vmem %s265_s20, 2048  ;;  %p5024_p12 = pmov %p5023_p5 }
  0x95   : > { %p2588_p11 = scmp.ne.s32.totalorder %s265_s20, %s2587_s12  ;;  %p2595_p3 = scmp.lt.s32.totalorder %s265_s20, %s265_s20 }
  0x96   : > { %p2596_p8 = scmp.lt.s32.totalorder %s2587_s12, %s2587_s12 }
  0x97   : > { %p2590_p7 = pnand %p2588_p11, %p5024_p12 }
  0x98   : > { %p2597_p10 = por %p2596_p8, %p2595_p3 }
  0x99   : > { %p2591_p13 = pneg %p2590_p7 }
  0x9b   : > { %p2598_p4 = pnand %p2597_p10, %p2591_p13 }
  0x9d   : > { %2601 = shalt.err (!%p2598_p4)
}
  0x9e   : > { %s2910_s25 = smov 128   ;;  %s5025_s6 = sld [smem:[#allocation30_spill]] }
  0x9f   : > { %s5026_s30 = sld [smem:[#allocation29_spill]]  ;;  %s2911_s17 = smov 8  }
  0xa0   : > { %2264 = dma.hbm_to_vmem [thread:$0]  (!%p3097_p2), %s5022_s4, 2048, %s265_s20, [#allocation9], %s2910_s25, %s2910_s25, %s2911_s17  }
  0xa1   : > { %s5027_s5 = sld [smem:[#allocation34_spill]]  ;;  %s2182_s29 = sshll.u32 %s2893_s14, 2 }
  0xa2   : > { %s2184_s7 = sshll.u32 %s5010_s18, 2  ;;  %s2183_s12 = sadd.s32 4, %s2182_s29 }
  0xa3   : > { %s2185_s0 = sadd.s32 4, %s2184_s7  ;;  %s2079_s22 = sadd.s32 4294967295, %s2183_s12 }
  0xa4   : > { %s2081_s1 = sadd.s32 4294967295, %s2185_s0  ;;  %s57_s8 = sadd.s32 1, %s2881_s11 }
  0xa5   : > { %s53_s13 = ssub.s32 %s2079_s22, %s2081_s1  ;;  %p64_p5 = scmp.ne.s32.totalorder %s2881_s11, %s5025_s6 }
  0xa6   : > { %s54_s3 = sor.u32 %s53_s13, %s3153_s24  ;;  %p70_p1 = scmp.ne.s32.totalorder %s5025_s6, %s5026_s30 }
  0xa7   : > { %p55_p6 = scmp.eq.s32.totalorder %s54_s3, 0  ;;  %p5028_p9 = scmp.eq.s32.totalorder %s2901_s16, 0 }
  0xa8   : > { %s2187_s20 = sadd.s32 8, %s2182_s29  ;;  %p5031_p2 = scmp.eq.s32.totalorder %s5027_s5, 0 }
  0xa9   : > { %p3257_p0 = por %p5028_p9, %p64_p5  ;;  %s2189_s1 = sadd.s32 8, %s2184_s7 }
  0xaa   : > { %s3262_s25 = scalar_select %p55_p6, %s2881_s11, %s57_s8  }
  0xab   : > { %p3266_p11 = por %p5031_p2, %p70_p1  ;;  %s115_s13 = ssub.s32 %s2187_s20, %s2189_s1 }
  0xac   : > { %5030 = sst [smem:[#allocation46_spill]] %s3262_s25  ;;  %s278_s17 = sand.u32 1, %s2881_s11  }
  0xad   : > { %s3272_s3 = sor.u32 %s115_s13, %s3153_s24  ;;  %s2088_s6 = sshll.u32 %s278_s17, 3 }
  0xae   : > { %s2091_s30 = sshll.u32 %s2079_s22, 1  ;;  %s5033_s28 = smul.u32 48, %s2897_s15 }
  0xaf   : > { %s282_s29 = scalar_lea.vmem [#allocation2], %s2088_s6  ;;  %s5034_s14 = sld [smem:[#allocation118_spill]] }
  0xb0   : > { %s291_s27 = sadd.s32 %s5033_s28, %s2091_s30  ;;  %s294_s12 = sshll.u32 %s282_s29, 4  ;;  %s3277_s12 = int_to_ptr.vmem [resolvable:$true] %s294_s12 }
  0xb1   : > { %s2092_s8 = sshll.u32 %s291_s27, 6  ;;  %p5036_p7 = scmp.lt.s32.totalorder %s2901_s16, 8 }
  0xb2   : > { %s3292_s22 = scalar_lea.sflag [#allocation3], %s278_s17 }
  0xb3   : > { %p3288_p13 = pnand %p5036_p7, %p3257_p0 }
  0xb5   : > { %s5035_s19 = smov %s5034_s14  ;;  %s3282_s25 = scalar_lea.hbm %s5034_s14, %s2092_s8 }
  0xb6   : > { %s2602_s7 = scalar_lea.hbm %s3282_s25, 128  ;;  %p2604_p8 = pneg %p3288_p13 }
  0xb7   : > { %p2603_p3 = scmp.ne.s32.totalorder %s3282_s25, %s2602_s7  ;;  %s2607_s18 = scalar_lea.hbm %s5035_s19, 6144 }
  0xb8   : > { %p2608_p5 = scmp.lt.u32.totalorder %s3282_s25, %s5035_s19  ;;  %p2609_p6 = scmp.lt.u32.totalorder %s2607_s18, %s2602_s7 }
  0xb9   : > { %p2605_p10 = pnand %p2604_p8, %p2603_p3  ;;  %p2611_p9 = scmp.lt.u32.totalorder %s2602_s7, %s3282_s25 }
  0xba   : > { %p2610_p1 = por %p2609_p6, %p2608_p5 }
  0xbb   : > { %p2606_p4 = pneg %p2605_p10 }
  0xbc   : > { %p2612_p0 = por %p2611_p9, %p2610_p1 }
  0xbe   : > { %p2613_p2 = pnand %p2612_p0, %p2606_p4 }
  0xc0   : > { %2616 = shalt.err (!%p2613_p2)
}
  0xc1   : > { %s2617_s1 = scalar_lea.vmem %s3277_s12, 128  ;;  %s2912_s13 = smov [#allocation2]  }
  0xc2   : > { %p2618_p7 = scmp.ne.s32.totalorder %s3277_s12, %s2617_s1  ;;  %s2622_s17 = sshll.u32 %s2912_s13, 4  ;;  %s2623_s17 = int_to_ptr.vmem [resolvable:$false] %s2622_s17 }
  0xc3   : > { %s2624_s6 = scalar_lea.vmem %s2623_s17, 256  ;;  %p2625_p12 = scmp.lt.s32.totalorder %s3277_s12, %s2623_s17 }
  0xc4   : > { %p2620_p3 = pnand %p2618_p7, %p2604_p8  ;;  %p2626_p5 = scmp.lt.s32.totalorder %s2624_s6, %s2617_s1 }
  0xc6   : > { %p2621_p10 = pneg %p2620_p3  ;;  %p2627_p6 = por %p2626_p5, %p2625_p12 }
  0xc8   : > { %p2628_p1 = pnand %p2627_p6, %p2621_p10 }
  0xca   : > { %2631 = shalt.err (!%p2628_p1)
}
  0xcb   : > { %s5038_s30 = smov 4   ;;  %s5039_s28 = smov 64  }
  0xcc   : > { %s5040_s27 = sld [smem:[#allocation26_spill]]  ;;  %s5041_s29 = sld [smem:[#allocation25_spill]] }
  0xcd   : > { %s5042_s8 = sld [smem:[#allocation24_spill]]  ;;  %p5043_p12 = scmp.eq.s32.totalorder %s3272_s3, 0 }
  0xce   : > { %2268 = dma.hbm_to_vmem [thread:$0]  (!%p3288_p13), %s3282_s25, 128, %s3277_s12, %s3292_s22, %s5039_s28, %s5039_s28, %s5038_s30  }
  0xcf   : > { %p5044_p9 = scmp.eq.s32.totalorder %s2901_s16, 0  ;;  %p5045_p2 = scmp.eq.s32.totalorder %s5027_s5, 0 }
  0xd0   : > { %s3343_s18 = scalar_lea.hbm %s3195_s9, 1024  ;;  %p5047_p13 = scmp.lt.s32.totalorder %s2901_s16, 8 }
  0xd1   : > { %s2662_s5 = scalar_lea.hbm %s3195_s9, 1152  ;;  %s2637_s1 = scalar_lea.hbm %s4885_s2, 6144 }
  0xd2   : > { %s119_s24 = sadd.s32 1, %s5040_s27  ;;  %p126_p8 = scmp.ne.s32.totalorder %s5040_s27, %s5041_s29 }
  0xd3   : > { %s3327_s7 = scalar_select %p5043_p12, %s5040_s27, %s119_s24  }
  0xd4   : > { %p132_p4 = scmp.ne.s32.totalorder %s5041_s29, %s5042_s8  ;;  %s330_s4 = sand.u32 1, %s5040_s27  }
  0xd5   : > { %p128_p0 = por %p126_p8, %p5044_p9  ;;  %s2096_s25 = sshll.u32 %s330_s4, 3 }
  0xd6   : > { %p3338_p7 = por %p132_p4, %p5045_p2  ;;  %s332_s12 = scalar_lea.vmem [#allocation7], %s2096_s25 }
  0xd7   : > { %p3347_p3 = pnand %p5047_p13, %p128_p0  ;;  %s343_s22 = sshll.u32 %s332_s12, 4  ;;  %s3351_s22 = int_to_ptr.vmem [resolvable:$true] %s343_s22 }
  0xd8   : > { %s5046_s14 = scalar_select %p3338_p7, 1, 0 }
  0xd9   : > { %p2633_p10 = scmp.ne.s32.totalorder %s3343_s18, %s2662_s5  ;;  %p2634_p5 = pneg %p3347_p3 }
  0xda   : > { %p2638_p12 = scmp.lt.u32.totalorder %s3343_s18, %s4885_s2  ;;  %p2639_p8 = scmp.lt.u32.totalorder %s2637_s1, %s2662_s5 }
  0xdb   : > { %p2635_p6 = pnand %p2634_p5, %p2633_p10  ;;  %p2641_p9 = scmp.lt.u32.totalorder %s2662_s5, %s3343_s18 }
  0xdc   : > { %p2640_p4 = por %p2639_p8, %p2638_p12 }
  0xdd   : > { %p2636_p1 = pneg %p2635_p6 }
  0xde   : > { %p2642_p0 = por %p2641_p9, %p2640_p4 }
  0xe0   : > { %p2643_p2 = pnand %p2642_p0, %p2636_p1 }
  0xe2   : > { %2646 = shalt.err (!%p2643_p2)
}
  0xe3   : > { %s2647_s9 = scalar_lea.vmem %s3351_s22, 128  ;;  %s2913_s6 = smov [#allocation7]  }
  0xe4   : > { %p2648_p13 = scmp.ne.s32.totalorder %s3351_s22, %s2647_s9  ;;  %s2652_s27 = sshll.u32 %s2913_s6, 4  ;;  %s2653_s27 = int_to_ptr.vmem [resolvable:$false] %s2652_s27 }
  0xe5   : > { %s2654_s29 = scalar_lea.vmem %s2653_s27, 256  ;;  %p2655_p7 = scmp.lt.s32.totalorder %s3351_s22, %s2653_s27 }
  0xe6   : > { %p2650_p10 = pnand %p2648_p13, %p2634_p5  ;;  %p2656_p12 = scmp.lt.s32.totalorder %s2654_s29, %s2647_s9 }
  0xe8   : > { %p2651_p6 = pneg %p2650_p10  ;;  %p2657_p8 = por %p2656_p12, %p2655_p7 }
  0xea   : > { %p2658_p4 = pnand %p2657_p8, %p2651_p6 }
  0xec   : > { %2661 = shalt.err (!%p2658_p4)
}
  0xed   : > { %2274 = dma.hbm_to_vmem [thread:$0]  (!%p3347_p3), %s3343_s18, 128, %s3351_s22, %s3197_s10, %s5039_s28, %s5039_s28, %s5038_s30  }
  0xee   : > { %s5049_s8 = sld [smem:[#allocation39_spill]] }
  0xf4   : > { %p5050_p5 = scmp.ne.s32.totalorder %s5049_s8, 0 }
  0xf6   : > { %355 = sbr.rel (%p5050_p5) target bundleno = 1036 (0x40c), region = 40 }
  0xfd   : > { %s5051_s24 = sld [smem:[#allocation30_spill]] }
 0x103   : > { %s357_s4 = sand.u32 1, %s5051_s24  }
 0x104   : > { %s2100_s25 = sshll.u32 %s357_s4, 3  ;;  %s358_s12 = scalar_lea.sflag [#allocation3], %s357_s4 }
 0x105   : > { %s361_s5 = scalar_lea.vmem [#allocation2], %s2100_s25 }
 0x106   : > { %2800 = dma.done.wait (%p3266_p11), %s358_s12, 128  }
 0x107   : > { %2802 = vsyncadd (%p3266_p11), %s358_s12, 4294967168  ;;  %s5052_s3 = sld [smem:[#allocation34_spill]]  ;;  %s5054_s20 = sld [smem:[#allocation42_spill]] }
 0x108   : > { %s5053_s21 = sld [smem:[#allocation27_spill]] }
 0x10d   : > { %s366_s1 = sand.u32 1, %s5052_s3   ;;  %p5055_p7 = scmp.ne.s32.totalorder %s5054_s20, 0 }
 0x10e   : > { %s368_s13 = sand.u32 1, %s5053_s21   ;;  %s367_s30 = scalar_lea.sflag [#allocation6], %s366_s1 }
 0x10f   : > { %s2101_s10 = sshll.u32 %s368_s13, 5 }
 0x110   : > { %s370_s28 = scalar_lea.vmem [#allocation5], %s2101_s10 }
 0x111   : > { %2804 = dma.done.wait (%p5055_p7), %s367_s30, 512  }
 0x112   : > { %2806 = vsyncadd (%p5055_p7), %s367_s30, 4294966784  ;;  %s5056_s18 = sld [smem:[#allocation25_spill]]  ;;  %p5057_p3 = scmp.ne.s32.totalorder %s5046_s14, 0 }
 0x118   : > { %s377_s22 = sand.u32 1, %s5056_s18  }
 0x119   : > { %s2102_s17 = sshll.u32 %s377_s22, 3 }
 0x11a   : > { %s379_s9 = scalar_lea.vmem [#allocation7], %s2102_s17 }
 0x11b   : > { %2808 = dma.done.wait (%p5057_p3), %s367_s30, 128  }
 0x11c   : > { %2810 = vsyncadd (%p5057_p3), %s367_s30, 4294967168  ;;  %p5058_p11 = scmp.eq.s32.totalorder %s5052_s3, 0 }
 0x11e   : > { %2812 = dma.done.wait (%p5058_p11), [#allocation9], 2816   ;;  %p5059_p1 = pmov %p5058_p11 }
 0x11f   : > { %v2461_v0 = vld [vmem:[%s361_s5] sm:$0xff]   ;;  %v3404_v5 = vld [vmem:[%s370_s28] sm:$0xff]   ;;  %s5060_s0 = sld [smem:[#allocation21_spill]]  ;;  %v3411_v11 = vld [vmem:[%s370_s28 + $0x8] sm:$0xff]   ;;  %v441_v21 = vlaneseq  ;;  %v4935_v27 = vmov 0.0   ;;  %s5061_s6 = sld [smem:[#allocation31_spill]] }
 0x120   : > { %2814 = vsyncadd (%p5059_p1), [#allocation9], 4294964480  ;;  %v2462_v1 = vld [vmem:[%s370_s28 + $0x10] sm:$0xff]   ;;  %v494_v2 = vunpack.c.l.bf16 %v2461_v0  ;;  %v495_v4 = vunpack.c.h.bf16 %v2461_v0  ;;  %v3406_v7 = vld [vmem:[%s370_s28 + $0x18] sm:$0xff]   ;;  %v496_v8 = vunpack.c.l.bf16 %v3404_v5  ;;  %v497_v9 = vunpack.c.h.bf16 %v3404_v5  ;;  %s5240_s29 = sld [smem:[#allocation23_spill]] }
 0x121   : > { %v500_v3 = vunpack.c.l.bf16 %v2462_v1  ;;  %v501_v6 = vunpack.c.h.bf16 %v2462_v1  ;;  %v502_v10 = vunpack.c.l.bf16 %v3406_v7  ;;  %v503_v12 = vunpack.c.h.bf16 %v3406_v7  ;;  %v3417_v14 = vld [vmem:[%s379_s9] sm:$0xff]   ;;  %v2470_v20 = vld [vmem:[#allocation10 + $0x14] ss:$8 sps:$4 sm:$0xff]  }
 0x122   : > { %508 = vadd.xlane.f32.xlu0 %v494_v2  ;;  %v498_v13 = vunpack.c.l.bf16 %v3411_v11  ;;  %v499_v15 = vunpack.c.h.bf16 %v3411_v11  ;;  %v504_v16 = vunpack.c.l.bf16 %v3417_v14  ;;  %v505_v17 = vunpack.c.h.bf16 %v3417_v14  ;;  %v2467_v18 = vld [vmem:[#allocation10 + $0x4] ss:$8 sps:$4 sm:$0xff]   ;;  %v2469_v19 = vld [vmem:[#allocation10] ss:$8 sps:$4 sm:$0xff]  }
 0x123   : > { %520 = vadd.xlane.f32.xlu1 %v500_v3  ;;  %791 = vmatprep.subr.bf16.mxu0 %v2467_v18  ;;  %v442_v22 = vand.u32 127, %v441_v21 }
 0x124   : > { %2223 = vmatprep.subr.bf16.mxu1 %v2467_v18  ;;  %792 = vmatpush1.bf16.msra.mxu0 %v2469_v19 }
 0x125   : > { %s428_s14 = sand.u32 1, %s5060_s0   ;;  %2231 = vmatpush1.bf16.msra.mxu1 %v2469_v19  ;;  %793 = vmatprep.subr.bf16.mxu0 %v2470_v20  ;;  %vm443_vm0 = vcmp.lt.s32.totalorder %v442_v22, 4  ;;  %s2129_s27 = sshll.u32 %s5061_s6, 6 }
 0x126   : > { %510 = vadd.xlane.f32.xlu0 %v495_v4  ;;  %2224 = vmatprep.subr.bf16.mxu1 %v2470_v20  ;;  %v3435_v28 = vsel %vm443_vm0, 1.0, %v4935_v27  ;;  %v2473_v20 = vld [vmem:[#allocation10 + $0x24] ss:$8 sps:$4 sm:$0xff]   ;;  %s421_s8 = sand.u32 1, %s5240_s29   ;;  %s4729_s25 = scalar_lea.vmem [#allocation12], %s428_s14 }
 0x127   : > { %522 = vadd.xlane.f32.xlu1 %v501_v6  ;;  %s2105_s24 = sshll.u32 %s421_s8, 5  ;;  %p2174_p9 = scmp.ne.s32.totalorder %s5061_s6, 0 }
 0x128   : > { %s4611_s4 = scalar_lea.vmem [#allocation11], %s2105_s24 }
 0x12a   : > { %512 = vadd.xlane.f32.xlu0 %v496_v8 }
 0x12b   : > { %514 = vadd.xlane.f32.xlu1 %v497_v9 }
 0x12e   : > { %524 = vadd.xlane.f32.xlu0 %v502_v10 }
 0x12f   : > { %526 = vadd.xlane.f32.xlu1 %v503_v12 }
 0x132   : > { %516 = vadd.xlane.f32.xlu0 %v498_v13 }
 0x133   : > { %518 = vadd.xlane.f32.xlu1 %v499_v15 }
 0x136   : > { %528 = vadd.xlane.f32.xlu0 %v504_v16 }
 0x137   : > { %530 = vadd.xlane.f32.xlu1 %v505_v17 }
 0x1af   : > { %v509_v23 = vpop.xlane.xlu0 %508 }
 0x1b0   : > { %v532_v24 = vmul.f32 0.25, %v509_v23  ;;  %v521_v25 = vpop.xlane.xlu1 %520 }
 0x1b1   : > { %v538_v26 = vmul.f32 0.25, %v521_v25 }
 0x1b2   : > { %v544_v29 = vsub.f32 %v494_v2, %v532_v24 }
 0x1b3   : > { %v550_v30 = vsub.f32 %v500_v3, %v538_v26  ;;  %v511_v31 = vpop.xlane.xlu0 %510  ;;  %v2478_v26 = vld [vmem:[#allocation10 + $0x30] ss:$8 sps:$4 sm:$0xff]  }
 0x1b4   : > { %v533_v32 = vmul.f32 0.25, %v511_v31  ;;  %v523_v33 = vpop.xlane.xlu1 %522  ;;  %v3438_v34 = vmul.f32 %v3435_v28, %v544_v29  ;;  %v2481_v29 = vld [vmem:[#allocation10 + $0x40] ss:$8 sps:$4 sm:$0xff]   ;;  %v2484_v31 = vld [vmem:[#allocation10 + $0x50] ss:$8 sps:$4 sm:$0xff]  }
 0x1b5   : > { %v539_v35 = vmul.f32 0.25, %v523_v33  ;;  %v3441_v36 = vmul.f32 %v3435_v28, %v550_v30  ;;  %v2482_v30 = vld [vmem:[#allocation10 + $0x54] ss:$8 sps:$4 sm:$0xff]   ;;  %v2487_v33 = vld [vmem:[#allocation10 + $0x60] ss:$8 sps:$4 sm:$0xff]  }
 0x1b6   : > { %v545_v37 = vsub.f32 %v495_v4, %v533_v32  ;;  %v568_v38 = vmul.f32 %v3438_v34, %v3438_v34  ;;  %v2485_v32 = vld [vmem:[#allocation10 + $0x64] ss:$8 sps:$4 sm:$0xff]  }
 0x1b7   : > { %v551_v39 = vsub.f32 %v501_v6, %v539_v35  ;;  %v513_v40 = vpop.xlane.xlu0 %512  ;;  %v574_v43 = vmul.f32 %v3441_v36, %v3441_v36  ;;  %v2488_v35 = vld [vmem:[#allocation10 + $0x74] ss:$8 sps:$4 sm:$0xff]  }
 0x1b8   : > { %v534_v41 = vmul.f32 0.25, %v513_v40  ;;  %580 = vadd.xlane.f32.xlu0 %v568_v38  ;;  %v515_v42 = vpop.xlane.xlu1 %514  ;;  %v3448_v44 = vmul.f32 %v3435_v28, %v545_v37  ;;  %v2490_v37 = vld [vmem:[#allocation10 + $0x70] ss:$8 sps:$4 sm:$0xff]   ;;  %v2915_v38 = vmov 0  }
 0x1b9   : > { %v535_v45 = vmul.f32 0.25, %v515_v42  ;;  %v3451_v46 = vmul.f32 %v3435_v28, %v551_v39  ;;  %823 = vmatprep.mubr.bf16.mxu0 %v2915_v38  ;;  %853 = vmatprep.mubr.bf16.mxu1 %v2915_v38 }
 0x1ba   : > { %v546_v47 = vsub.f32 %v496_v8, %v534_v41  ;;  %v569_v48 = vmul.f32 %v3448_v44, %v3448_v44 }
 0x1bb   : > { %v547_v49 = vsub.f32 %v497_v9, %v535_v45  ;;  %v525_v50 = vpop.xlane.xlu0 %524  ;;  %v575_v53 = vmul.f32 %v3451_v46, %v3451_v46 }
 0x1bc   : > { %v540_v51 = vmul.f32 0.25, %v525_v50  ;;  %592 = vadd.xlane.f32.xlu0 %v574_v43  ;;  %582 = vadd.xlane.f32.xlu1 %v569_v48  ;;  %v527_v52 = vpop.xlane.xlu1 %526  ;;  %v3458_v54 = vmul.f32 %v3435_v28, %v546_v47 }
 0x1bd   : > { %v541_v55 = vmul.f32 0.25, %v527_v52  ;;  %v3461_v56 = vmul.f32 %v3435_v28, %v547_v49 }
 0x1be   : > { %v552_v57 = vsub.f32 %v502_v10, %v540_v51  ;;  %v570_v58 = vmul.f32 %v3458_v54, %v3458_v54 }
 0x1bf   : > { %v553_v59 = vsub.f32 %v503_v12, %v541_v55  ;;  %v517_v60 = vpop.xlane.xlu0 %516  ;;  %v571_v63 = vmul.f32 %v3461_v56, %v3461_v56  ;;  %v2472_v12 = vld [vmem:[#allocation10 + $0x10] ss:$8 sps:$4 sm:$0xff]  }
 0x1c0   : > { %v536_v61 = vmul.f32 0.25, %v517_v60  ;;  %594 = vadd.xlane.f32.xlu1 %v575_v53  ;;  %584 = vadd.xlane.f32.xlu0 %v570_v58  ;;  %v519_v62 = vpop.xlane.xlu1 %518  ;;  %v3472_v0 = vmul.f32 %v3435_v28, %v552_v57 }
 0x1c1   : > { %v537_v1 = vmul.f32 0.25, %v519_v62  ;;  %v3475_v2 = vmul.f32 %v3435_v28, %v553_v59  ;;  %794 = vmatpush1.bf16.msra.mxu0 %v2472_v12  ;;  %2232 = vmatpush1.bf16.msra.mxu1 %v2472_v12 }
 0x1c2   : > { %v548_v3 = vsub.f32 %v498_v13, %v536_v61  ;;  %v576_v4 = vmul.f32 %v3472_v0, %v3472_v0  ;;  %795 = vmatprep.subr.bf16.mxu0 %v2473_v20  ;;  %2225 = vmatprep.subr.bf16.mxu1 %v2473_v20 }
 0x1c3   : > { %v549_v5 = vsub.f32 %v499_v15, %v537_v1  ;;  %v529_v6 = vpop.xlane.xlu0 %528  ;;  %v577_v9 = vmul.f32 %v3475_v2, %v3475_v2 }
 0x1c4   : > { %v542_v7 = vmul.f32 0.25, %v529_v6  ;;  %586 = vadd.xlane.f32.xlu1 %v571_v63  ;;  %596 = vadd.xlane.f32.xlu0 %v576_v4  ;;  %v531_v8 = vpop.xlane.xlu1 %530  ;;  %v3486_v10 = vmul.f32 %v3435_v28, %v548_v3 }
 0x1c5   : > { %v543_v18 = vmul.f32 0.25, %v531_v8  ;;  %v3489_v13 = vmul.f32 %v3435_v28, %v549_v5  ;;  %v3512_v8 = vld [vmem:[#allocation8 + $0x12] ss:$0 sm:$0xff] }
 0x1c6   : > { %v554_v11 = vsub.f32 %v504_v16, %v542_v7  ;;  %v572_v15 = vmul.f32 %v3486_v10, %v3486_v10  ;;  %v2475_v16 = vld [vmem:[#allocation10 + $0x20] ss:$8 sps:$4 sm:$0xff]  }
 0x1c7   : > { %v555_v19 = vsub.f32 %v505_v17, %v543_v18  ;;  %v573_v22 = vmul.f32 %v3489_v13, %v3489_v13  ;;  %796 = vmatpush1.bf16.msra.mxu0 %v2475_v16  ;;  %2233 = vmatpush1.bf16.msra.mxu1 %v2475_v16  ;;  %v2476_v17 = vld [vmem:[#allocation10 + $0x34] ss:$8 sps:$4 sm:$0xff]  }
 0x1c8   : > { %598 = vadd.xlane.f32.xlu1 %v577_v9  ;;  %588 = vadd.xlane.f32.xlu0 %v572_v15  ;;  %v3500_v23 = vmul.f32 %v3435_v28, %v554_v11 }
 0x1c9   : > { %v3503_v24 = vmul.f32 %v3435_v28, %v555_v19  ;;  %797 = vmatprep.subr.bf16.mxu0 %v2476_v17  ;;  %2226 = vmatprep.subr.bf16.mxu1 %v2476_v17  ;;  %v2479_v28 = vld [vmem:[#allocation10 + $0x44] ss:$8 sps:$4 sm:$0xff]  }
 0x1ca   : > { %v578_v25 = vmul.f32 %v3500_v23, %v3500_v23 }
 0x1cb   : > { %v579_v14 = vmul.f32 %v3503_v24, %v3503_v24  ;;  %798 = vmatpush1.bf16.msra.mxu0 %v2478_v26  ;;  %2234 = vmatpush1.bf16.msra.mxu1 %v2478_v26 }
 0x1cc   : > { %590 = vadd.xlane.f32.xlu1 %v573_v22  ;;  %600 = vadd.xlane.f32.xlu0 %v578_v25 }
 0x1cd   : > { %799 = vmatprep.subr.bf16.mxu0 %v2479_v28  ;;  %2227 = vmatprep.subr.bf16.mxu1 %v2479_v28 }
 0x1cf   : > { %800 = vmatpush1.bf16.msra.mxu0 %v2481_v29  ;;  %2235 = vmatpush1.bf16.msra.mxu1 %v2481_v29 }
 0x1d0   : > { %602 = vadd.xlane.f32.xlu1 %v579_v14  ;;  %801 = vmatprep.subr.bf16.mxu0 %v2482_v30 }
 0x1d1   : > { %2228 = vmatprep.subr.bf16.mxu1 %v2482_v30 }
 0x1d3   : > { %802 = vmatpush1.bf16.msra.mxu0 %v2484_v31  ;;  %2236 = vmatpush1.bf16.msra.mxu1 %v2484_v31 }
 0x1d4   : > { %803 = vmatprep.subr.bf16.mxu0 %v2485_v32  ;;  %2229 = vmatprep.subr.bf16.mxu1 %v2485_v32 }
 0x1d7   : > { %804 = vmatpush1.bf16.msra.mxu0 %v2487_v33  ;;  %2237 = vmatpush1.bf16.msra.mxu1 %v2487_v33 }
 0x1d8   : > { %805 = vmatprep.subr.bf16.mxu0 %v2488_v35  ;;  %2230 = vmatprep.subr.bf16.mxu1 %v2488_v35 }
 0x1db   : > { %806 = vmatpush1.bf16.msra.mxu0 %v2490_v37  ;;  %2238 = vmatpush1.bf16.msra.mxu1 %v2490_v37 }
 0x245   : > { %v581_v39 = vpop.xlane.xlu0 %580 }
 0x246   : > { %v604_v40 = vmul.f32 0.25, %v581_v39 }
 0x248   : > { %v616_v41 = vadd.f32 1e-06, %v604_v40 }
 0x249   : > { %v583_v42 = vpop.xlane.xlu1 %582  ;;  %v593_v43 = vpop.xlane.xlu0 %592 }
 0x24a   : > { %2491 = vrsqrt.f32 %v616_v41  ;;  %v605_v45 = vmul.f32 0.25, %v583_v42  ;;  %v610_v47 = vmul.f32 0.25, %v593_v43 }
 0x24c   : > { %v617_v48 = vadd.f32 1e-06, %v605_v45  ;;  %v622_v49 = vadd.f32 1e-06, %v610_v47 }
 0x24d   : > { %v595_v50 = vpop.xlane.xlu1 %594  ;;  %v585_v51 = vpop.xlane.xlu0 %584 }
 0x24e   : > { %2493 = vrsqrt.f32 %v617_v48  ;;  %v611_v52 = vmul.f32 0.25, %v595_v50  ;;  %v606_v53 = vmul.f32 0.25, %v585_v51 }
 0x24f   : > { %2495 = vrsqrt.f32 %v622_v49 }
 0x250   : > { %v623_v55 = vadd.f32 1e-06, %v611_v52  ;;  %v618_v57 = vadd.f32 1e-06, %v606_v53 }
 0x251   : > { %v587_v58 = vpop.xlane.xlu1 %586  ;;  %v597_v59 = vpop.xlane.xlu0 %596 }
 0x252   : > { %2497 = vrsqrt.f32 %v623_v55  ;;  %v607_v60 = vmul.f32 0.25, %v587_v58  ;;  %v612_v61 = vmul.f32 0.25, %v597_v59 }
 0x253   : > { %2499 = vrsqrt.f32 %v618_v57 }
 0x254   : > { %v2492_v62 = vpop.eup %2491  ;;  %v619_v63 = vadd.f32 1e-06, %v607_v60  ;;  %v624_v1 = vadd.f32 1e-06, %v612_v61 }
 0x255   : > { %v599_v3 = vpop.xlane.xlu1 %598  ;;  %v589_v4 = vpop.xlane.xlu0 %588  ;;  %v640_v5 = vmul.f32 %v2492_v62, %v3438_v34  ;;  %v3516_v34 = vld [vmem:[#allocation8 + $0x13] ss:$0 sm:$0xff] }
 0x256   : > { %2501 = vrsqrt.f32 %v619_v63  ;;  %v613_v6 = vmul.f32 0.25, %v599_v3  ;;  %v608_v7 = vmul.f32 0.25, %v589_v4 }
 0x257   : > { %2503 = vrsqrt.f32 %v624_v1  ;;  %v652_v22 = vmul.f32 %v640_v5, %v3512_v8 }
 0x258   : > { %v2494_v9 = vpop.eup %2493  ;;  %v625_v12 = vadd.f32 1e-06, %v613_v6  ;;  %v620_v18 = vadd.f32 1e-06, %v608_v7 }
 0x259   : > { %v2496_v11 = vpop.eup %2495  ;;  %v591_v15 = vpop.xlane.xlu1 %590  ;;  %v641_v20 = vmul.f32 %v2494_v9, %v3448_v44  ;;  %v664_v32 = vadd.f32 %v652_v22, %v3516_v34 }
 0x25a   : > { %v601_v19 = vpop.xlane.xlu0 %600  ;;  %2505 = vrsqrt.f32 %v625_v12  ;;  %v609_v16 = vmul.f32 0.25, %v591_v15  ;;  %v646_v14 = vmul.f32 %v2496_v11, %v3441_v36 }
 0x25b   : > { %v614_v25 = vmul.f32 0.25, %v601_v19  ;;  %2507 = vrsqrt.f32 %v620_v18  ;;  %v653_v17 = vmul.f32 %v641_v20, %v3512_v8  ;;  %v3556_v19 = vshrl.u32 %v441_v21, 7 }
 0x25c   : > { %v2498_v26 = vpop.eup %2497  ;;  %v621_v28 = vadd.f32 1e-06, %v609_v16  ;;  %v658_v35 = vmul.f32 %v646_v14, %v3512_v8  ;;  %v3559_v20 = vstv %s2129_s27 }
 0x25d   : > { %v626_v29 = vadd.f32 1e-06, %v614_v25  ;;  %v2500_v30 = vpop.eup %2499  ;;  %v603_v31 = vpop.xlane.xlu1 %602  ;;  %v665_v44 = vadd.f32 %v653_v17, %v3516_v34  ;;  %v647_v33 = vmul.f32 %v2498_v26, %v3451_v46  ;;  %v892_v21 = vadd.s32 56, %v3556_v19 }
 0x25e   : > { %2509 = vrsqrt.f32 %v621_v28  ;;  %v615_v37 = vmul.f32 0.25, %v603_v31  ;;  %v642_v36 = vmul.f32 %v2500_v30, %v3458_v54  ;;  %v670_v45 = vadd.f32 %v658_v35, %v3516_v34  ;;  %v699_v31 = vld [vmem:[#allocation8 + $0x14] ss:$8 sm:$0x3] }
 0x25f   : > { %2511 = vrsqrt.f32 %v626_v29  ;;  %v676_v39 = vpack.c.bf16 %v665_v44, %v664_v32  ;;  %v659_v40 = vmul.f32 %v647_v33, %v3512_v8  ;;  %v3569_v17 = vsub.s32 0, %v3556_v19  ;;  %v1427_v32 = vld [vmem:[#allocation8 + $0x1] ss:$8 sm:$0x3] }
 0x260   : > { %v2502_v41 = vpop.eup %2501  ;;  %v627_v42 = vadd.f32 1e-06, %v615_v37  ;;  %v654_v48 = vmul.f32 %v642_v36, %v3512_v8  ;;  %v3572_v26 = vsub.s32 1, %v3556_v19  ;;  %v906_v29 = vadd.s32 %v3559_v20, %v892_v21  ;;  %v1371_v44 = vld [vmem:[#allocation8] ss:$8 sm:$0x3] }
 0x261   : > { %v2504_v43 = vpop.eup %2503  ;;  %824 = vmatmul.mubr.bf16.vlgmr.msra.gmra.mrb[0].mxu0 %v676_v39  ;;  %v671_v47 = vadd.f32 %v659_v40, %v3516_v34  ;;  %v643_v46 = vmul.f32 %v2502_v41, %v3461_v56  ;;  %v3576_v30 = vadd.s32 16, %v3556_v19  ;;  %v3579_v33 = vrot.slane %v699_v31, %v3569_v17  ;;  %v1370_v37 = vld [vmem:[#allocation8 + $0x11] ss:$8 sm:$0x3] }
 0x262   : > { %2513 = vrsqrt.f32 %v627_v42  ;;  %833 = vmatprep.mubr.bf16.mxu0 %v2915_v38  ;;  %v648_v54 = vmul.f32 %v2504_v43, %v3472_v0  ;;  %v666_v53 = vadd.f32 %v654_v48, %v3516_v34  ;;  %v3582_v35 = vrot.slane %v699_v31, %v3572_v26 }
 0x263   : > { %v679_v49 = vpack.c.bf16 %v671_v47, %v670_v45  ;;  %v655_v50 = vmul.f32 %v643_v46, %v3512_v8  ;;  %v2137_v36 = vadd.s32 4294967280, %v906_v29  ;;  %v901_v39 = vadd.s32 %v3559_v20, %v3576_v30  ;;  %v1472_v46 = vld [vmem:[#allocation8 + $0x2] ss:$8 sm:$0x3] }
 0x264   : > { %v2506_v51 = vpop.eup %2505  ;;  %v660_v56 = vmul.f32 %v648_v54, %v3512_v8  ;;  %5062 = vst [vmem:[#allocation47_spill] sm:$0xff] %v3582_v35  ;;  %v3590_v41 = vrot.slane %v1427_v32, %v3569_v17  ;;  %v3593_v42 = vrot.slane %v1427_v32, %v3572_v26  ;;  %v3602_v47 = vrot.slane %v1371_v44, %v3569_v17 }
 0x265   : > { %v2508_v52 = vpop.eup %2507  ;;  %854 = vmatmul.mubr.bf16.vlgmr.msra.gmra.mrb[0].mxu1 %v679_v49  ;;  %v667_v55 = vadd.f32 %v655_v50, %v3516_v34  ;;  %v649_v57 = vmul.f32 %v2506_v51, %v3475_v2  ;;  %v3608_v54 = vadd.s32 24, %v3556_v19  ;;  %v3611_v49 = vrot.slane %v1370_v37, %v3569_v17  ;;  %v1562_v51 = vld [vmem:[#allocation8 + $0x4] ss:$8 sm:$0x3] }
 0x266   : > { %863 = vmatprep.mubr.bf16.mxu1 %v2915_v38  ;;  %v644_v58 = vmul.f32 %v2508_v52, %v3486_v10  ;;  %v672_v62 = vadd.f32 %v660_v56, %v3516_v34  ;;  %v1060_v52 = vand.u32 15, %v892_v21  ;;  %vm930_vm11 = vcmp.ge.s32.totalorder %v2137_v36, 0 }
 0x267   : > { %v677_v59 = vpack.c.bf16 %v667_v55, %v666_v53  ;;  %v661_v0 = vmul.f32 %v649_v57, %v3512_v8  ;;  %v3614_v53 = vadd.s32 64, %v3556_v19  ;;  %vm942_vm12 = vcmp.lt.s32.totalorder %v2137_v36, 256 }
 0x268   : > { %v2510_v60 = vpop.eup %2509  ;;  %v656_v2 = vmul.f32 %v644_v58, %v3512_v8  ;;  %v2132_v55 = vadd.s32 4294967280, %v901_v39  ;;  %v3617_v57 = vadd.s32 72, %v3556_v19  ;;  %v3620_v56 = vrot.slane %v1472_v46, %v3569_v17  ;;  %vm3646_vm14 = vmand %vm930_vm11, %vm942_vm12 }
 0x269   : > { %v2512_v61 = vpop.eup %2511  ;;  %834 = vmatmul.mubr.bf16.gmra.mrb[4].mxu0 %v677_v59  ;;  %v673_v63 = vadd.f32 %v661_v0, %v3516_v34  ;;  %v645_v1 = vmul.f32 %v2510_v60, %v3489_v13  ;;  %v3623_v58 = vrot.slane %v1371_v44, %v3572_v26  ;;  %v3626_v59 = vrot.slane %v1472_v46, %v3572_v26 }
 0x26a   : > { %843 = vmatprep.mubr.bf16.mxu0 %v2915_v38  ;;  %v650_v3 = vmul.f32 %v2512_v61, %v3500_v23  ;;  %v668_v6 = vadd.f32 %v656_v2, %v3516_v34  ;;  %v3629_v0 = vadd.s32 32, %v3556_v19  ;;  %v3632_v60 = vrot.slane %v1370_v37, %v3572_v26 }
 0x26b   : > { %v680_v4 = vpack.c.bf16 %v673_v63, %v672_v62  ;;  %v657_v10 = vmul.f32 %v645_v1, %v3512_v8  ;;  %v3635_v61 = vrot.slane %v1562_v51, %v3569_v17  ;;  %v1697_v62 = vld [vmem:[#allocation8 + $0x7] ss:$8 sm:$0x3]  ;;  %v902_v63 = vadd.s32 %v3559_v20, %v3608_v54 }
 0x26c   : > { %v2514_v5 = vpop.eup %2513  ;;  %v662_v13 = vmul.f32 %v650_v3, %v3512_v8  ;;  %v3640_v1 = vadd.s32 40, %v3556_v19  ;;  %vm3650_vm15 = vcmp.ne.s32.totalorder %v1060_v52, 15  ;;  %vm925_vm0 = vcmp.ge.s32.totalorder %v2132_v55, 0 }
 0x26d   : > { %864 = vmatmul.mubr.bf16.gmra.mrb[4].mxu1 %v680_v4  ;;  %v669_v7 = vadd.f32 %v657_v10, %v3516_v34  ;;  %v651_v9 = vmul.f32 %v2514_v5, %v3503_v24  ;;  %v886_v24 = vadd.s32 8, %v3556_v19  ;;  %v907_v10 = vadd.s32 %v3559_v20, %v3614_v53 }
 0x26e   : > { %873 = vmatprep.mubr.bf16.mxu1 %v2915_v38  ;;  %v674_v23 = vadd.f32 %v662_v13, %v3516_v34  ;;  %v891_v38 = vadd.s32 48, %v3556_v19  ;;  %v3657_v5 = vadd.s32 80, %v3556_v19  ;;  %v3665_v13 = vrot.slane %v1697_v62, %v3569_v17 }
 0x26f   : > { %v678_v12 = vpack.c.bf16 %v669_v7, %v668_v6  ;;  %v663_v18 = vmul.f32 %v651_v9, %v3512_v8  ;;  %v899_v8 = vadd.s32 %v3559_v20, %v3556_v19  ;;  %v900_v22 = vadd.s32 %v3559_v20, %v886_v24  ;;  %v1517_v6 = vld [vmem:[#allocation8 + $0x3] ss:$8 sm:$0x3] }
 0x270   : > { %v905_v16 = vadd.s32 %v3559_v20, %v891_v38  ;;  %v1018_v28 = vand.u32 15, %v886_v24  ;;  %v1053_v50 = vand.u32 15, %v891_v38  ;;  %v908_v7 = vadd.s32 %v3559_v20, %v3617_v57 }
 0x271   : > { %844 = vmatmul.mubr.bf16.gmra.mrb[8].mxu0 %v678_v12  ;;  %v675_v11 = vadd.f32 %v663_v18, %v3516_v34  ;;  %v2130_v25 = vadd.s32 4294967280, %v899_v8  ;;  %v2131_v34 = vadd.s32 4294967280, %v900_v22  ;;  %v3662_v9 = vadd.s32 88, %v3556_v19  ;;  %v1742_v8 = vld [vmem:[#allocation8 + $0x10] ss:$8 sm:$0x3] }
 0x272   : > { %v2136_v14 = vadd.s32 4294967280, %v905_v16  ;;  %vm1188_vm9 = vcmp.ne.s32.totalorder %v1018_v28, 15  ;;  %vm3642_vm13 = vcmp.ne.s32.totalorder %v1053_v50, 0  ;;  %v3668_v12 = vrot.slane %v1562_v51, %v3572_v26 }
 0x273   : > { %v681_v15 = vpack.c.bf16 %v675_v11, %v674_v23  ;;  %vm923_vm1 = vcmp.ge.s32.totalorder %v2130_v25, 0  ;;  %vm935_vm2 = vcmp.lt.s32.totalorder %v2130_v25, 256  ;;  %vm924_vm3 = vcmp.ge.s32.totalorder %v2131_v34, 0  ;;  %5069 = vst [vmem:[#allocation48_spill] sm:$0xff] %v3662_v9 }
 0x274   : > { %vm936_vm4 = vcmp.lt.s32.totalorder %v2131_v34, 256  ;;  %vm929_vm5 = vcmp.ge.s32.totalorder %v2136_v14, 0  ;;  %vm941_vm6 = vcmp.lt.s32.totalorder %v2136_v14, 256  ;;  %vm947_vm7 = vmand %vm923_vm1, %vm935_vm2  ;;  %v3599_v45 = vsel %vm1188_vm9, 1.0, %v4935_v27 }
 0x275   : > { %874 = vmatmul.mubr.bf16.gmra.mrb[8].mxu1 %v681_v15  ;;  %vm948_vm8 = vmand %vm924_vm3, %vm936_vm4  ;;  %v3587_v40 = vsel %vm947_vm7, 1.0, %v4935_v27  ;;  %vm937_vm1 = vcmp.lt.s32.totalorder %v2132_v55, 256  ;;  %v3671_v18 = vrot.slane %v1697_v62, %v3572_v26  ;;  %v1607_v23 = vld [vmem:[#allocation8 + $0x5] ss:$8 sm:$0x3]  ;;  %v903_v15 = vadd.s32 %v3559_v20, %v3629_v0 }
 0x276   : > { %vm953_vm10 = vmand %vm929_vm5, %vm941_vm6  ;;  %v3596_v43 = vsel %vm948_vm8, 1.0, %v4935_v27  ;;  %v1652_v11 = vld [vmem:[#allocation8 + $0x6] ss:$8 sm:$0x3]  ;;  %v3678_v24 = vsel %vm3642_vm13, 1.0, %v4935_v27  ;;  %v3683_v38 = vsel %vm3646_vm14, 1.0, %v4935_v27  ;;  %v904_v16 = vadd.s32 %v3559_v20, %v3640_v1 }
 0x277   : > { %v3605_v48 = vsel %vm953_vm10, 1.0, %v4935_v27  ;;  %5070 = vst [vmem:[#allocation49_spill] sm:$0xff] %v3678_v24  ;;  %v2133_v22 = vadd.s32 4294967280, %v902_v63  ;;  %v3690_v25 = vsel %vm3650_vm15, 1.0, %v4935_v27  ;;  %v3693_v34 = vrot.slane %v1517_v6, %v3569_v17  ;;  %vm949_vm2 = vmand %vm925_vm0, %vm937_vm1 }
 0x278   : > { %v2138_v14 = vadd.s32 4294967280, %v907_v10  ;;  %v909_v21 = vadd.s32 %v3559_v20, %v3657_v5  ;;  %v3700_v28 = vrot.slane %v1607_v23, %v3569_v17  ;;  %v3703_v29 = vrot.slane %v1652_v11, %v3569_v17 }
 0x279   : > { %v2139_v31 = vadd.s32 4294967280, %v908_v7  ;;  %v910_v32 = vadd.s32 %v3559_v20, %v3662_v9  ;;  %v3708_v44 = vrot.slane %v1742_v8, %v3569_v17  ;;  %v3711_v37 = vrot.slane %v1517_v6, %v3572_v26 }
 0x27a   : > { %v1025_v36 = vand.u32 15, %v3576_v30  ;;  %v2134_v39 = vadd.s32 4294967280, %v903_v15  ;;  %v3715_v46 = vsel %vm949_vm2, 1.0, %v4935_v27  ;;  %vm926_vm3 = vcmp.ge.s32.totalorder %v2133_v22, 0 }
 0x27b   : > { %vm938_vm4 = vcmp.lt.s32.totalorder %v2133_v22, 256  ;;  %v2135_v50 = vadd.s32 4294967280, %v904_v16  ;;  %v1032_v51 = vand.u32 15, %v3608_v54  ;;  %vm931_vm5 = vcmp.ge.s32.totalorder %v2138_v14, 0 }
 0x27c   : > { %vm943_vm6 = vcmp.lt.s32.totalorder %v2138_v14, 256  ;;  %v2140_v20 = vadd.s32 4294967280, %v909_v21  ;;  %v1067_v17 = vand.u32 15, %v3614_v53  ;;  %vm932_vm7 = vcmp.ge.s32.totalorder %v2139_v31, 0  ;;  %vm3723_vm10 = vmand %vm926_vm3, %vm938_vm4 }
 0x27d   : > { %vm944_vm8 = vcmp.lt.s32.totalorder %v2139_v31, 256  ;;  %v2141_v52 = vadd.s32 4294967280, %v910_v32  ;;  %vm3719_vm9 = vcmp.ne.s32.totalorder %v1025_v36, 0  ;;  %vm927_vm11 = vcmp.ge.s32.totalorder %v2134_v39, 0  ;;  %vm3728_vm13 = vmand %vm931_vm5, %vm943_vm6 }
 0x27e   : > { %vm939_vm12 = vcmp.lt.s32.totalorder %v2134_v39, 256  ;;  %v1039_v54 = vand.u32 15, %v3629_v0  ;;  %vm928_vm14 = vcmp.ge.s32.totalorder %v2135_v50, 0  ;;  %vm940_vm15 = vcmp.lt.s32.totalorder %v2135_v50, 256  ;;  %vm3737_vm0 = vmand %vm932_vm7, %vm944_vm8 }
 0x27f   : > { %v1046_v53 = vand.u32 15, %v3640_v1  ;;  %v1081_v63 = vand.u32 15, %v3657_v5  ;;  %v3735_v2 = vrot.slane %v1607_v23, %v3572_v26  ;;  %v1074_v4 = vand.u32 15, %v3617_v57  ;;  %vm3751_vm5 = vmand %vm927_vm11, %vm939_vm12 }
 0x280   : > { %vm945_vm2 = vcmp.lt.s32.totalorder %v2140_v20, 256  ;;  %vm3742_vm3 = vcmp.ne.s32.totalorder %v1032_v51, 15  ;;  %vm3746_vm4 = vcmp.ne.s32.totalorder %v1067_v17, 0  ;;  %vm934_vm6 = vcmp.ge.s32.totalorder %v2141_v52, 0  ;;  %vm3774_vm12 = vmand %vm928_vm14, %vm940_vm15 }
 0x281   : > { %vm946_vm7 = vcmp.lt.s32.totalorder %v2141_v52, 256  ;;  %vm1247_vm8 = vcmp.lt.s32.totalorder %v3556_v19, 1  ;;  %v3758_v57 = vrot.slane %v1652_v11, %v3572_v26  ;;  %v3761_v5 = vrot.slane %v1742_v8, %v3572_v26 }
 0x282   : > { %v3766_v6 = vsel %vm3719_vm9, 1.0, %v4935_v27  ;;  %vm3768_vm11 = vcmp.ne.s32.totalorder %v1039_v54, 0  ;;  %v3781_v26 = vsel %vm3723_vm10, 1.0, %v4935_v27  ;;  %v3786_v11 = vsel %vm3728_vm13, 1.0, %v4935_v27  ;;  %vm958_vm13 = vmand %vm934_vm6, %vm946_vm7 }
 0x283   : > { %vm3788_vm9 = vcmp.ne.s32.totalorder %v1046_v53, 15  ;;  %vm5091_vm1 = vcmp.ge.s32.totalorder %v2140_v20, 0  ;;  %vm3798_vm15 = vcmp.ne.s32.totalorder %v1081_v63, 0  ;;  %v3805_v14 = vsel %vm3742_vm3, 1.0, %v4935_v27 }
 0x284   : > { %vm3794_vm14 = vmand %vm5091_vm1, %vm945_vm2  ;;  %5096 = vst [vmem:[#allocation50_spill] sm:$0xff] %v3805_v14  ;;  %v3810_v21 = vsel %vm3746_vm4, 1.0, %v4935_v27  ;;  %v3815_v31 = vsel %vm3737_vm0, 1.0, %v4935_v27  ;;  %vm1196_vm10 = vcmp.ne.s32.totalorder %v1074_v4, 15  ;;  %v3823_v39 = vsel %vm3751_vm5, 1.0, %v4935_v27 }
 0x285   : > { %5097 = vst [vmem:[#allocation51_spill] sm:$0xff] %v3823_v39  ;;  %v3828_v50 = vsel %vm3768_vm11, 1.0, %v4935_v27  ;;  %v3833_v51 = vsel %vm3774_vm12, 1.0, %v4935_v27  ;;  %v3839_v52 = vsel %vm3788_vm9, 1.0, %v4935_v27  ;;  %v3844_v55 = vsel %vm3794_vm14, 1.0, %v4935_v27 }
 0x286   : > { %5098 = vst [vmem:[#allocation52_spill] sm:$0xff] %v3828_v50  ;;  %5099 = vst [vmem:[#allocation53_spill] sm:$0xff] %v3833_v51  ;;  %v3849_v30 = vsel %vm3798_vm15, 1.0, %v4935_v27  ;;  %v3856_v63 = vsel %vm1196_vm10, 1.0, %v4935_v27  ;;  %v3859_v3 = vsel %vm958_vm13, 1.0, %v4935_v27  ;;  %vm5111_vm0 = vcmp.lt.s32.totalorder %v3556_v19, 7 }
 0x287   : > { %5100 = vst [vmem:[#allocation54_spill] sm:$0xff] %v3839_v52  ;;  %5101 = vst [vmem:[#allocation55_spill] sm:$0xff] %v3844_v55 }
 0x288   : > { %5102 = vst [vmem:[#allocation56_spill] sm:$0xff] %v3849_v30  ;;  %5104 = vst [vmem:[#allocation58_spill] sm:$0xff] %v3856_v63 }
 0x289   : > { %5105 = vst [vmem:[#allocation59_spill] sm:$0xff] %v3859_v3  ;;  %vm5118_vm1 = vmmov %vm5111_vm0 }
 0x28a   : > { %vm5132_vm2 = vmmov %vm5111_vm0 }
 0x28b   : > { %vm5148_vm3 = vmmov %vm5111_vm0 }
 0x28c   : > { %vm5158_vm4 = vmmov %vm5111_vm0 }
 0x28d   : > { %vm5164_vm5 = vmmov %vm5111_vm0 }
 0x28e   : > { %vm5166_vm6 = vmmov %vm5111_vm0 }
 0x28f   : > { %vm5168_vm7 = vmmov %vm5111_vm0 }
 0x290   : > { %vm5175_vm11 = vmmov %vm5111_vm0 }
 0x291   : > { %vm5183_vm12 = vmmov %vm5111_vm0 }
 0x292   : > { %vm5184_vm9 = vmmov %vm5111_vm0 }
 0x293   : > { %vm5192_vm14 = vmmov %vm5111_vm0 }
 0x294   : > { %vm5204_vm15 = vmmov %vm5111_vm0 }
 0x295   : > { %vm5211_vm10 = vmmov %vm5111_vm0 }
 0x296   : > { %vm5219_vm13 = vmmov %vm5111_vm0 }
 0x334   : > { %v825_v16 = vpop.f32.mrb[0].mxu0 }
 0x335   : > { %v826_v32 = vadd.f32 %v825_v16, %v3579_v33  ;;  %v827_v36 = vpop.f32.mrb[1].mxu0 }
 0x336   : > { %v828_v20 = vadd.f32 %v827_v36, %v3582_v35  ;;  %v829_v17 = vpop.f32.mrb[2].mxu0 }
 0x337   : > { %v3852_v54 = vmul.f32 %v3587_v40, %v826_v32  ;;  %v830_v62 = vadd.f32 %v829_v17, %v3579_v33  ;;  %v831_v53 = vpop.f32.mrb[3].mxu0 }
 0x338   : > { %v3862_v4 = vmul.f32 %v3587_v40, %v828_v20  ;;  %v832_v0 = vadd.f32 %v831_v53, %v3582_v35  ;;  %v855_v10 = vpop.f32.mrb[0].mxu1 }
 0x339   : > { %5103 = vst [vmem:[#allocation57_spill] sm:$0xff] %v3852_v54  ;;  %v4939_v23 = vrot.slane %v3852_v54, 7  ;;  %v3871_v8 = vmul.f32 %v3590_v41, %v3852_v54  ;;  %v3874_v22 = vmul.f32 %v3596_v43, %v830_v62  ;;  %v857_v40 = vpop.f32.mrb[1].mxu1  ;;  %v856_v7 = vadd.f32 %v855_v10, %v3579_v33 }
 0x33a   : > { %5106 = vst [vmem:[#allocation60_spill] sm:$0xff] %v3862_v4  ;;  %v3880_v36 = vmul.f32 %v3593_v42, %v3862_v4  ;;  %v3883_v20 = vmul.f32 %v3596_v43, %v832_v0  ;;  %v859_v17 = vpop.f32.mrb[2].mxu1  ;;  %v858_v43 = vadd.f32 %v857_v40, %v3582_v35 }
 0x33b   : > { %5107 = vst [vmem:[#allocation61_spill] sm:$0xff] %v3871_v8  ;;  %v4940_v53 = vrot.slane %v3874_v22, 7  ;;  %v1441_v62 = vmul.f32 %v3590_v41, %v3874_v22  ;;  %v861_v1 = vpop.f32.mrb[3].mxu1  ;;  %v5109_v10 = vrot.slane %v3874_v22, 1  ;;  %v3908_v32 = vmul.f32 %v3605_v48, %v856_v7 }
 0x33c   : > { %5108 = vst [vmem:[#allocation62_spill] sm:$0xff] %v3880_v36  ;;  %v1442_v15 = vmul.f32 %v3593_v42, %v3883_v20  ;;  %v835_v0 = vpop.f32.mrb[4].mxu0  ;;  %v5110_v36 = vrot.slane %v3852_v54, 1  ;;  %v860_v40 = vadd.f32 %v859_v17, %v3579_v33  ;;  %v5117_v7 = vrot.slane %v3862_v4, 1 }
 0x33d   : > { %v1268_v27 = vsel %vm1247_vm8, %v4939_v23, %v4940_v53  ;;  %5112 = vst [vmem:[#allocation63_spill] sm:$0xff] %v3908_v32  ;;  %v837_v8 = vpop.f32.mrb[5].mxu0  ;;  %v5114_v23 = vrot.slane %v3883_v20, 7  ;;  %v5115_v53 = vrot.slane %v3862_v4, 7  ;;  %v3952_v63 = vmul.f32 %v3605_v48, %v858_v43 }
 0x33e   : > { %v1341_v16 = vsel %vm5111_vm0, %v5110_v36, %v5109_v10  ;;  %v1385_v3 = vmul.f32 %v3602_v47, %v1268_v27  ;;  %v5116_v36 = vrot.slane %v3883_v20, 1  ;;  %v839_v10 = vpop.f32.mrb[6].mxu0  ;;  %v838_v55 = vadd.f32 %v837_v8, %v3582_v35 }
 0x33f   : > { %v3913_v9 = vmul.f32 %v3620_v56, %v1341_v16  ;;  %v1269_v54 = vsel %vm1247_vm8, %v5115_v53, %v5114_v23  ;;  %v3933_v30 = vpop.f32.mrb[7].mxu0  ;;  %v3938_v53 = vmul.f32 %v3590_v41, %v3908_v32  ;;  %5123 = vst [vmem:[#allocation69_spill] sm:$0xff] %v3952_v63  ;;  %v3981_v8 = vmul.f32 %v3668_v12, %v3952_v63 }
 0x340   : > { %v1342_v17 = vsel %vm5118_vm1, %v5117_v7, %v5116_v36  ;;  %v1386_v27 = vmul.f32 %v3623_v58, %v1269_v54  ;;  %v1412_v23 = vadd.f32 %v3611_v49, %v1385_v3  ;;  %v3942_v36 = vmul.f32 %v3635_v61, %v3908_v32  ;;  %v3948_v7 = vpop.f32.mrb[4].mxu1  ;;  %vm5233_vm1 = vmmov %vm5111_vm0 }
 0x341   : > { %5113 = vst [vmem:[#allocation64_spill] sm:$0xff] %v3913_v9  ;;  %v3929_v16 = vmul.f32 %v3626_v59, %v1342_v17  ;;  %5120 = vst [vmem:[#allocation66_spill] sm:$0xff] %v3938_v53  ;;  %v3946_v54 = vmul.f32 %v3665_v13, %v3908_v32  ;;  %v3955_v3 = vmul.f32 %v3683_v38, %v860_v40  ;;  %v5147_v51 = vrot.slane %v3952_v63, 1 }
 0x342   : > { %5121 = vst [vmem:[#allocation67_spill] sm:$0xff] %v3942_v36  ;;  %v1413_v17 = vadd.f32 %v3632_v60, %v1386_v27  ;;  %v862_v9 = vadd.f32 %v861_v1, %v3582_v35  ;;  %v3960_v4 = vadd.f32 %v1441_v62, %v1412_v23  ;;  %v836_v53 = vadd.f32 %v835_v0, %v3579_v33 }
 0x343   : > { %5119 = vst [vmem:[#allocation65_spill] sm:$0xff] %v3929_v16  ;;  %5122 = vst [vmem:[#allocation68_spill] sm:$0xff] %v3946_v54  ;;  %v3958_v16 = vpop.f32.mrb[5].mxu1  ;;  %v3965_v54 = vadd.f32 %v839_v10, %v3579_v33  ;;  %v3975_v1 = vmul.f32 %v3593_v42, %v3952_v63  ;;  %v3985_v0 = vmul.f32 %v3671_v18, %v3952_v63  ;;  %v5129_v10 = vrot.slane %v3908_v32, 7 }
 0x344   : > { %v3967_v27 = vpop.f32.mrb[6].mxu1  ;;  %v3969_v48 = vadd.f32 %v1442_v15, %v1413_v17  ;;  %5125 = vst [vmem:[#allocation71_spill] sm:$0xff] %v3981_v8  ;;  %v4950_v15 = vrot.slane %v3955_v3, 7  ;;  %v3989_v23 = vpop.f32.mrb[8].mxu0  ;;  %v1453_v17 = vmul.f32 %v3590_v41, %v3955_v3  ;;  %v3995_v40 = vmul.f32 %v3635_v61, %v3955_v3 }
 0x345   : > { %5124 = vst [vmem:[#allocation70_spill] sm:$0xff] %v3975_v1  ;;  %v3977_v62 = vpop.f32.mrb[7].mxu1  ;;  %5126 = vst [vmem:[#allocation72_spill] sm:$0xff] %v3985_v0  ;;  %v3999_v43 = vmul.f32 %v3665_v13, %v3955_v3  ;;  %v4002_v1 = vmul.f32 %v3683_v38, %v862_v9  ;;  %v4004_v0 = vpop.f32.mrb[9].mxu0  ;;  %v5130_v36 = vrot.slane %v3955_v3, 1  ;;  %v4021_v9 = vmul.f32 %v3715_v46, %v836_v53 }
 0x346   : > { %5127 = vst [vmem:[#allocation73_spill] sm:$0xff] %v3995_v40  ;;  %v1256_v8 = vsel %vm1247_vm8, %v5129_v10, %v4950_v15  ;;  %v5131_v40 = vrot.slane %v3908_v32, 1  ;;  %v4024_v38 = vmul.f32 %v3715_v46, %v838_v55 }
 0x347   : > { %5128 = vst [vmem:[#allocation74_spill] sm:$0xff] %v3999_v43  ;;  %v4026_v43 = vpop.f32.mrb[10].mxu0  ;;  %v1397_v24 = vmul.f32 %v3602_v47, %v1256_v8  ;;  %v4030_v10 = vmul.f32 %v3693_v34, %v1256_v8  ;;  %v5144_v53 = vrot.slane %v4002_v1, 7 }
 0x348   : > { %v4018_v52 = vsel %vm5132_vm2, %v5131_v40, %v5130_v36  ;;  %5134 = vst [vmem:[#allocation76_spill] sm:$0xff] %v4026_v43  ;;  %v4037_v36 = vmul.f32 %v3703_v29, %v1256_v8  ;;  %v4039_v40 = vpop.f32.mrb[11].mxu0  ;;  %v4049_v32 = vpop.f32.mrb[8].mxu1  ;;  %v4054_v8 = vmul.f32 %v3668_v12, %v4002_v1  ;;  %v5163_v43 = vrot.slane %v3883_v20, 1  ;;  %vm5235_vm2 = vmmov %vm5111_vm0 }
 0x349   : > { %5133 = vst [vmem:[#allocation75_spill] sm:$0xff] %v4018_v52  ;;  %5135 = vst [vmem:[#allocation77_spill] sm:$0xff] %v4030_v10  ;;  %v4034_v15 = vmul.f32 %v3700_v28, %v4018_v52  ;;  %v4043_v46 = vmul.f32 %v3708_v44, %v4018_v52  ;;  %v1454_v10 = vmul.f32 %v3593_v42, %v4002_v1  ;;  %v1227_v52 = vrot.slane %v4021_v9, 7  ;;  %v4061_v55 = vpop.f32.mrb[9].mxu1 }
 0x34a   : > { %5137 = vst [vmem:[#allocation79_spill] sm:$0xff] %v4037_v36  ;;  %5138 = vst [vmem:[#allocation80_spill] sm:$0xff] %v4039_v40  ;;  %v4058_v36 = vmul.f32 %v3671_v18, %v4002_v1  ;;  %v4080_v14 = vpop.f32.mrb[10].mxu1 }
 0x34b   : > { %5136 = vst [vmem:[#allocation78_spill] sm:$0xff] %v4034_v15  ;;  %5139 = vst [vmem:[#allocation81_spill] sm:$0xff] %v4043_v46  ;;  %v1424_v15 = vadd.f32 %v3611_v49, %v1397_v24  ;;  %v5145_v46 = vrot.slane %v3952_v63, 7  ;;  %v5146_v24 = vrot.slane %v4002_v1, 1 }
 0x34c   : > { %5140 = vst [vmem:[#allocation82_spill] sm:$0xff] %v4049_v32  ;;  %5141 = vst [vmem:[#allocation83_spill] sm:$0xff] %v4054_v8 }
 0x34d   : > { %5142 = vst [vmem:[#allocation84_spill] sm:$0xff] %v4058_v36  ;;  %5143 = vst [vmem:[#allocation85_spill] sm:$0xff] %v4061_v55  ;;  %v1257_v32 = vsel %vm1247_vm8, %v5145_v46, %v5144_v53  ;;  %v4075_v8 = vsel %vm5148_vm3, %v5147_v51, %v5146_v24  ;;  %v1300_v36 = vrot.slane %v4021_v9, 1  ;;  %v1443_v55 = vmul.f32 %v3590_v41, %v4021_v9  ;;  %v4092_v51 = vpop.f32.mrb[11].mxu1 }
 0x34e   : > { %5149 = vst [vmem:[#allocation86_spill] sm:$0xff] %v4075_v8  ;;  %5150 = vst [vmem:[#allocation87_spill] sm:$0xff] %v4080_v14  ;;  %v4082_v50 = vadd.f32 %v1453_v17, %v1424_v15  ;;  %v1398_v40 = vmul.f32 %v3623_v58, %v1257_v32  ;;  %v4086_v46 = vmul.f32 %v3711_v37, %v1257_v32  ;;  %v5156_v15 = vrot.slane %v3874_v22, 7 }
 0x34f   : > { %v4090_v53 = vmul.f32 %v3735_v2, %v4075_v8  ;;  %5153 = vst [vmem:[#allocation90_spill] sm:$0xff] %v4092_v51  ;;  %v4095_v24 = vmul.f32 %v3758_v57, %v1257_v32  ;;  %v4099_v63 = vmul.f32 %v3761_v5, %v4075_v8  ;;  %v5157_v14 = vrot.slane %v3874_v22, 1  ;;  %vm5255_vm3 = vmmov %vm5111_vm0 }
 0x350   : > { %5151 = vst [vmem:[#allocation88_spill] sm:$0xff] %v4086_v46  ;;  %v1266_v17 = vsel %vm1247_vm8, %v5156_v15, %v1227_v52  ;;  %v4114_v8 = vmul.f32 %v3635_v61, %v4021_v9  ;;  %v1444_v22 = vmul.f32 %v3593_v42, %v4024_v38 }
 0x351   : > { %5152 = vst [vmem:[#allocation89_spill] sm:$0xff] %v4090_v53  ;;  %5154 = vst [vmem:[#allocation91_spill] sm:$0xff] %v4095_v24  ;;  %v1339_v46 = vsel %vm5158_vm4, %v5157_v14, %v1300_v36  ;;  %v1425_v53 = vadd.f32 %v3632_v60, %v1398_v40  ;;  %v1276_v51 = vmul.f32 %v3766_v6, %v1266_v17  ;;  %v1301_v24 = vrot.slane %v4024_v38, 1 }
 0x352   : > { %5155 = vst [vmem:[#allocation92_spill] sm:$0xff] %v4099_v63  ;;  %v1347_v32 = vmul.f32 %v3599_v45, %v1339_v46  ;;  %5159 = vst [vmem:[#allocation93_spill] sm:$0xff] %v4114_v8  ;;  %v1228_v63 = vrot.slane %v4024_v38, 7  ;;  %v4122_v14 = vmul.f32 %v3668_v12, %v4024_v38  ;;  %v5162_v17 = vrot.slane %v3883_v20, 7 }
 0x353   : > { %v4124_v40 = vadd.f32 %v1454_v10, %v1425_v53  ;;  %v1387_v15 = vmul.f32 %v3602_v47, %v1276_v51  ;;  %v4129_v9 = vmul.f32 %v3693_v34, %v1276_v51  ;;  %v1340_v38 = vsel %vm5164_vm5, %v5163_v43, %v1301_v24 }
 0x354   : > { %5160 = vst [vmem:[#allocation94_spill] sm:$0xff] %v4122_v14  ;;  %v1486_v46 = vmul.f32 %v3620_v56, %v1347_v32  ;;  %v1267_v8 = vsel %vm1247_vm8, %v5162_v17, %v1228_v63  ;;  %v4141_v10 = vmul.f32 %v3781_v26, %v3965_v54  ;;  %v842_v53 = vadd.f32 %v3933_v30, %v3582_v35 }
 0x355   : > { %5161 = vst [vmem:[#allocation95_spill] sm:$0xff] %v4129_v9  ;;  %v1414_v51 = vadd.f32 %v3611_v49, %v1387_v15  ;;  %v1277_v32 = vmul.f32 %v3766_v6, %v1267_v8  ;;  %v1348_v14 = vmul.f32 %v3599_v45, %v1340_v38 }
 0x356   : > { %v1502_v17 = vadd.f32 %v1486_v46, %v3960_v4  ;;  %v4962_v20 = vrot.slane %v4141_v10, 7  ;;  %v4961_v9 = vrot.slane %v4141_v10, 1  ;;  %v1445_v43 = vmul.f32 %v3590_v41, %v4141_v10 }
 0x357   : > { %v1576_v54 = vmul.f32 %v3635_v61, %v4141_v10  ;;  %v1459_v39 = vadd.f32 %v1443_v55, %v1414_v51  ;;  %v1388_v30 = vmul.f32 %v3623_v58, %v1277_v32  ;;  %v1487_v15 = vmul.f32 %v3626_v59, %v1348_v14 }
 0x358   : > { %v4158_v6 = vmul.f32 %v3711_v37, %v1277_v32  ;;  %v1264_v45 = vsel %vm1247_vm8, %v1227_v52, %v4962_v20  ;;  %v1337_v4 = vsel %vm5166_vm6, %v1300_v36, %v4961_v9  ;;  %v4169_v8 = vmul.f32 %v3781_v26, %v842_v53  ;;  %vm5281_vm6 = vmmov %vm5111_vm0 }
 0x359   : > { %v866_v55 = vadd.f32 %v3948_v7, %v3579_v33  ;;  %v1415_v14 = vadd.f32 %v3632_v60, %v1388_v30  ;;  %v1389_v46 = vmul.f32 %v3602_v47, %v1264_v45  ;;  %v1488_v38 = vmul.f32 %v3620_v56, %v1337_v4 }
 0x35a   : > { %5165 = vst [vmem:[#allocation96_spill] sm:$0xff] %v4158_v6  ;;  %v1531_v51 = vmul.f32 %v3693_v34, %v1264_v45  ;;  %v4178_v52 = vmul.f32 %v3700_v28, %v1337_v4  ;;  %v4964_v32 = vrot.slane %v4169_v8, 7  ;;  %v4963_v36 = vrot.slane %v4169_v8, 1 }
 0x35b   : > { %v1446_v26 = vmul.f32 %v3593_v42, %v4169_v8  ;;  %v1460_v53 = vadd.f32 %v1444_v22, %v1415_v14  ;;  %v1416_v7 = vadd.f32 %v3611_v49, %v1389_v46  ;;  %v4185_v30 = vadd.f32 %v1488_v38, %v1459_v39 }
 0x35c   : > { %5167 = vst [vmem:[#allocation97_spill] sm:$0xff] %v4178_v52  ;;  %v1547_v9 = vadd.f32 %v1531_v51, %v1502_v17  ;;  %v1265_v45 = vsel %vm1247_vm8, %v1228_v63, %v4964_v32  ;;  %v1338_v4 = vsel %vm5168_vm7, %v1301_v24, %v4963_v36  ;;  %v1503_v20 = vadd.f32 %v1487_v15, %v3969_v48  ;;  %vm5296_vm7 = vmmov %vm5111_vm0 }
 0x35d   : > { %v1577_v22 = vmul.f32 %v3668_v12, %v4169_v8  ;;  %v4198_v14 = vadd.f32 %v1445_v43, %v1416_v7  ;;  %v1390_v17 = vmul.f32 %v3623_v58, %v1265_v45  ;;  %v1489_v46 = vmul.f32 %v3626_v59, %v1338_v4 }
 0x35e   : > { %v4200_v39 = vadd.f32 %v1576_v54, %v1547_v9  ;;  %v1532_v63 = vmul.f32 %v3711_v37, %v1265_v45  ;;  %v4206_v38 = vmul.f32 %v3735_v2, %v1338_v4  ;;  %v999_v24 = vmul.f32 %v3786_v11, %v866_v55 }
 0x35f   : > { %v868_v48 = vadd.f32 %v3958_v16, %v3582_v35  ;;  %v1417_v15 = vadd.f32 %v3632_v60, %v1390_v17  ;;  %v4212_v43 = vadd.f32 %v1489_v46, %v1460_v53  ;;  %v870_v9 = vadd.f32 %v3967_v27, %v3579_v33 }
 0x360   : > { %5169 = vst [vmem:[#allocation98_spill] sm:$0xff] %v4206_v38  ;;  %v872_v54 = vadd.f32 %v3977_v62, %v3582_v35  ;;  %v1548_v51 = vadd.f32 %v1532_v63, %v1503_v20  ;;  %v1239_v7 = vrot.slane %v999_v24, 7  ;;  %v1312_v45 = vrot.slane %v999_v24, 1 }
 0x361   : > { %v4219_v4 = vmul.f32 %v3635_v61, %v999_v24  ;;  %v4221_v55 = vadd.f32 %v1446_v26, %v1417_v15  ;;  %v4224_v16 = vmul.f32 %v3665_v13, %v999_v24  ;;  %v1000_v53 = vmul.f32 %v3786_v11, %v868_v48 }
 0x362   : > { %v4228_v17 = vmul.f32 %v3815_v31, %v870_v9  ;;  %v4230_v27 = vadd.f32 %v1577_v22, %v1548_v51  ;;  %v5173_v62 = vrot.slane %v3955_v3, 7  ;;  %v5174_v46 = vrot.slane %v3955_v3, 1 }
 0x363   : > { %5170 = vst [vmem:[#allocation99_spill] sm:$0xff] %v4219_v4  ;;  %5171 = vst [vmem:[#allocation100_spill] sm:$0xff] %v4224_v16  ;;  %v4241_v63 = vmul.f32 %v3815_v31, %v872_v54  ;;  %v1240_v48 = vrot.slane %v1000_v53, 7  ;;  %v1313_v22 = vrot.slane %v1000_v53, 1  ;;  %v4246_v15 = vmul.f32 %v3668_v12, %v1000_v53 }
 0x364   : > { %5172 = vst [vmem:[#allocation101_spill] sm:$0xff] %v4228_v17  ;;  %v1254_v20 = vsel %vm1247_vm8, %v5173_v62, %v1239_v7  ;;  %v1327_v26 = vsel %vm5175_vm11, %v5174_v46, %v1312_v45  ;;  %v4249_v9 = vmul.f32 %v3671_v18, %v1000_v53  ;;  %v4966_v3 = vrot.slane %v4228_v17, 7  ;;  %vm5298_vm11 = vmmov %vm5111_vm0 }
 0x365   : > { %5176 = vst [vmem:[#allocation102_spill] sm:$0xff] %v4241_v63  ;;  %v1288_v11 = vmul.f32 %v3810_v21, %v1254_v20  ;;  %v1359_v24 = vmul.f32 %v3690_v25, %v1327_v26  ;;  %5177 = vst [vmem:[#allocation103_spill] sm:$0xff] %v4246_v15  ;;  %v4965_v51 = vrot.slane %v4228_v17, 1  ;;  %v5181_v46 = vrot.slane %v4002_v1, 7 }
 0x366   : > { %5178 = vst [vmem:[#allocation104_spill] sm:$0xff] %v4249_v9  ;;  %v5182_v26 = vrot.slane %v4002_v1, 1  ;;  %v1252_v32 = vsel %vm1247_vm8, %v1239_v7, %v4966_v3  ;;  %v4294_v7 = vmul.f32 %v3665_v13, %v4228_v17  ;;  %v1589_v15 = vmul.f32 %v3668_v12, %v4241_v63 }
 0x367   : > { %v4254_v62 = vmul.f32 %v3693_v34, %v1288_v11  ;;  %v4257_v31 = vmul.f32 %v3700_v28, %v1359_v24  ;;  %v4260_v54 = vmul.f32 %v3703_v29, %v1288_v11  ;;  %v4263_v20 = vmul.f32 %v3708_v44, %v1359_v24 }
 0x368   : > { %v1255_v53 = vsel %vm1247_vm8, %v5181_v46, %v1240_v48  ;;  %v1328_v36 = vsel %vm5183_vm12, %v5182_v26, %v1313_v22  ;;  %v4281_v11 = vsel %vm5184_vm9, %v1312_v45, %v4965_v51  ;;  %v1498_v1 = vmul.f32 %v3620_v56, %v1359_v24  ;;  %5185 = vst [vmem:[#allocation107_spill] sm:$0xff] %v4294_v7  ;;  %vm5301_vm12 = vmmov %vm5111_vm0 }
 0x369   : > { %5179 = vst [vmem:[#allocation105_spill] sm:$0xff] %v4254_v62  ;;  %5180 = vst [vmem:[#allocation106_spill] sm:$0xff] %v4260_v54  ;;  %v1289_v38 = vmul.f32 %v3810_v21, %v1255_v53  ;;  %v1360_v46 = vmul.f32 %v3690_v25, %v1328_v36  ;;  %v1543_v6 = vmul.f32 %v3693_v34, %v1252_v32  ;;  %v4967_v53 = vrot.slane %v4241_v63, 7 }
 0x36a   : > { %v1588_v26 = vmul.f32 %v3635_v61, %v4228_v17  ;;  %v4290_v52 = vmul.f32 %v3703_v29, %v1252_v32  ;;  %v4298_v45 = vmul.f32 %v3708_v44, %v4281_v11  ;;  %v1514_v24 = vadd.f32 %v1498_v1, %v4082_v50  ;;  %v5223_v17 = vld [vmem:[#allocation69_spill] sm:$0xff]  ;;  %vm5303_vm9 = vmmov %vm5111_vm0 }
 0x36b   : > { %v4301_v25 = vmul.f32 %v3711_v37, %v1289_v38  ;;  %v4304_v21 = vmul.f32 %v3735_v2, %v1360_v46  ;;  %v4307_v36 = vmul.f32 %v3758_v57, %v1289_v38  ;;  %v4310_v32 = vmul.f32 %v3761_v5, %v1360_v46 }
 0x36c   : > { %5186 = vst [vmem:[#allocation108_spill] sm:$0xff] %v4298_v45  ;;  %v4968_v51 = vrot.slane %v4241_v63, 1  ;;  %v1499_v3 = vmul.f32 %v3626_v59, %v1360_v46  ;;  %v4320_v45 = vmul.f32 %v3671_v18, %v4241_v63  ;;  %v846_v38 = vadd.f32 %v3989_v23, %v3579_v33 }
 0x36d   : > { %5187 = vst [vmem:[#allocation109_spill] sm:$0xff] %v4301_v25  ;;  %5188 = vst [vmem:[#allocation110_spill] sm:$0xff] %v4304_v21  ;;  %v848_v25 = vadd.f32 %v4004_v0, %v3582_v35  ;;  %v1559_v50 = vadd.f32 %v1543_v6, %v1514_v24  ;;  %v1253_v1 = vsel %vm1247_vm8, %v1240_v48, %v4967_v53  ;;  %v5196_v6 = vld [vmem:[#allocation51_spill] sm:$0xff] }
 0x36e   : > { %5189 = vst [vmem:[#allocation111_spill] sm:$0xff] %v4307_v36  ;;  %5190 = vst [vmem:[#allocation112_spill] sm:$0xff] %v4310_v32  ;;  %v4334_v46 = vsel %vm5192_vm14, %v1313_v22, %v4968_v51  ;;  %v1544_v9 = vmul.f32 %v3711_v37, %v1253_v1  ;;  %v4339_v23 = vmul.f32 %v3758_v57, %v1253_v1  ;;  %v5198_v22 = vld [vmem:[#allocation76_spill] sm:$0xff]  ;;  %v5224_v32 = vrot.slane %v5223_v17, 7 }
 0x36f   : > { %5191 = vst [vmem:[#allocation113_spill] sm:$0xff] %v4320_v45  ;;  %5193 = vst [vmem:[#allocation114_spill] sm:$0xff] %v4334_v46  ;;  %v1515_v45 = vadd.f32 %v1499_v3, %v4124_v40  ;;  %v4343_v0 = vmul.f32 %v3761_v5, %v4334_v46  ;;  %v991_v24 = vmul.f32 %v5196_v6, %v846_v38  ;;  %v5199_v40 = vld [vmem:[#allocation80_spill] sm:$0xff] }
 0x370   : > { %5194 = vst [vmem:[#allocation115_spill] sm:$0xff] %v4339_v23  ;;  %v4346_v48 = vadd.f32 %v1588_v26, %v1559_v50  ;;  %v4349_v53 = vmul.f32 %v5196_v6, %v848_v25  ;;  %v850_v51 = vadd.f32 %v5198_v22, %v3579_v33  ;;  %v852_v3 = vadd.f32 %v5199_v40, %v3582_v35  ;;  %v5205_v40 = vld [vmem:[#allocation52_spill] sm:$0xff]  ;;  %v5206_v26 = vld [vmem:[#allocation50_spill] sm:$0xff] }
 0x371   : > { %5195 = vst [vmem:[#allocation116_spill] sm:$0xff] %v4343_v0  ;;  %v1560_v63 = vadd.f32 %v1544_v9, %v1515_v45  ;;  %v1231_v1 = vrot.slane %v991_v24, 7  ;;  %v1304_v16 = vrot.slane %v991_v24, 1  ;;  %v1447_v23 = vmul.f32 %v3590_v41, %v991_v24 }
 0x372   : > { %5197 = vst [vmem:[#allocation51_spill] sm:$0xff] %v4346_v48  ;;  %v1578_v0 = vmul.f32 %v3635_v61, %v991_v24  ;;  %v4358_v38 = vmul.f32 %v3665_v13, %v991_v24  ;;  %v5202_v6 = vrot.slane %v4141_v10, 7  ;;  %v5203_v45 = vrot.slane %v4141_v10, 1 }
 0x373   : > { %v4362_v50 = vadd.f32 %v1589_v15, %v1560_v63  ;;  %v1448_v24 = vmul.f32 %v3593_v42, %v4349_v53  ;;  %v5207_v63 = vrot.slane %v4349_v53, 7  ;;  %v5208_v15 = vrot.slane %v4169_v8, 7 }
 0x374   : > { %5200 = vst [vmem:[#allocation76_spill] sm:$0xff] %v4358_v38  ;;  %v1262_v9 = vsel %vm1247_vm8, %v5202_v6, %v1231_v1  ;;  %v1335_v22 = vsel %vm5204_vm15, %v5203_v45, %v1304_v16  ;;  %v5209_v6 = vrot.slane %v4349_v53, 1  ;;  %v5210_v10 = vrot.slane %v4169_v8, 1 }
 0x375   : > { %5201 = vst [vmem:[#allocation80_spill] sm:$0xff] %v4362_v50  ;;  %v1280_v38 = vmul.f32 %v5205_v40, %v1262_v9  ;;  %v1351_v48 = vmul.f32 %v5206_v26, %v1335_v22  ;;  %v1263_v25 = vsel %vm1247_vm8, %v5208_v15, %v5207_v63  ;;  %v1579_v22 = vmul.f32 %v3668_v12, %v4349_v53 }
 0x376   : > { %v1336_v45 = vsel %vm5211_vm10, %v5210_v10, %v5209_v6  ;;  %v1281_v50 = vmul.f32 %v5205_v40, %v1263_v25  ;;  %v4394_v36 = vmul.f32 %v3671_v18, %v4349_v53 }
 0x377   : > { %v1352_v9 = vmul.f32 %v5206_v26, %v1336_v45  ;;  %v1391_v63 = vmul.f32 %v3602_v47, %v1280_v38  ;;  %v1490_v15 = vmul.f32 %v3620_v56, %v1351_v48  ;;  %v1533_v8 = vmul.f32 %v3693_v34, %v1280_v38 }
 0x378   : > { %5212 = vst [vmem:[#allocation52_spill] sm:$0xff] %v4394_v36  ;;  %v1621_v54 = vmul.f32 %v3700_v28, %v1351_v48  ;;  %v4401_v6 = vmul.f32 %v3703_v29, %v1280_v38  ;;  %v1392_v26 = vmul.f32 %v3623_v58, %v1281_v50  ;;  %v1534_v40 = vmul.f32 %v3711_v37, %v1281_v50 }
 0x379   : > { %v4405_v25 = vmul.f32 %v3626_v59, %v1352_v9  ;;  %v1418_v10 = vadd.f32 %v3611_v49, %v1391_v63  ;;  %v1549_v45 = vadd.f32 %v1533_v8, %v4185_v30  ;;  %v4411_v36 = vmul.f32 %v3735_v2, %v1352_v9 }
 0x37a   : > { %5213 = vst [vmem:[#allocation50_spill] sm:$0xff] %v4401_v6  ;;  %v4414_v21 = vmul.f32 %v3758_v57, %v1281_v50  ;;  %v1419_v48 = vadd.f32 %v3632_v60, %v1392_v26  ;;  %v1550_v38 = vadd.f32 %v1534_v40, %v4212_v43  ;;  %v5215_v6 = vld [vmem:[#allocation53_spill] sm:$0xff]  ;;  %v1506_v46 = vadd.f32 %v1490_v15, %v4198_v14 }
 0x37b   : > { %v993_v4 = vmul.f32 %v5215_v6, %v850_v51  ;;  %v1463_v62 = vadd.f32 %v1447_v23, %v1418_v10  ;;  %v1594_v35 = vadd.f32 %v1578_v0, %v1549_v45  ;;  %v1637_v63 = vadd.f32 %v1621_v54, %v4200_v39  ;;  %v5216_v23 = vld [vmem:[#allocation63_spill] sm:$0xff] }
 0x37c   : > { %5214 = vst [vmem:[#allocation117_spill] sm:$0xff] %v4414_v21  ;;  %v4422_v30 = vmul.f32 %v5215_v6, %v852_v3  ;;  %v1464_v9 = vadd.f32 %v1448_v24, %v1419_v48  ;;  %v4424_v8 = vadd.f32 %v1579_v22, %v1550_v38  ;;  %v5217_v0 = vrot.slane %v5216_v23, 7  ;;  %v5221_v22 = vld [vmem:[#allocation54_spill] sm:$0xff] }
 0x37d   : > { %v1233_v50 = vrot.slane %v993_v4, 7  ;;  %v1306_v21 = vrot.slane %v993_v4, 1  ;;  %v1449_v26 = vmul.f32 %v3590_v41, %v993_v4  ;;  %v1580_v43 = vmul.f32 %v3635_v61, %v993_v4  ;;  %v5220_v61 = vld [vmem:[#allocation49_spill] sm:$0xff] }
 0x37e   : > { %v1711_v51 = vmul.f32 %v3665_v13, %v993_v4  ;;  %v1234_v14 = vrot.slane %v4422_v30, 7  ;;  %v5218_v3 = vrot.slane %v5216_v23, 1 }
 0x37f   : > { %v1258_v39 = vsel %vm1247_vm8, %v1233_v50, %v5217_v0  ;;  %v1260_v54 = vsel %vm1247_vm8, %v1231_v1, %v1233_v50  ;;  %v1333_v41 = vsel %vm5111_vm0, %v1304_v16, %v1306_v21 }
 0x380   : > { %v1331_v24 = vsel %vm5219_vm13, %v1306_v21, %v5218_v3  ;;  %v4443_v4 = vmul.f32 %v5220_v61, %v1258_v39  ;;  %v1393_v6 = vmul.f32 %v3602_v47, %v1260_v54  ;;  %v1492_v40 = vmul.f32 %v3620_v56, %v1333_v41 }
 0x381   : > { %v1355_v15 = vmul.f32 %v5221_v22, %v1331_v24  ;;  %v1535_v10 = vmul.f32 %v3693_v34, %v1260_v54  ;;  %v1623_v1 = vmul.f32 %v3700_v28, %v1333_v41  ;;  %v1666_v45 = vmul.f32 %v3703_v29, %v1260_v54 }
 0x382   : > { %v4452_v48 = vmul.f32 %v3708_v44, %v1333_v41  ;;  %v1420_v16 = vadd.f32 %v3611_v49, %v1393_v6  ;;  %v1508_v38 = vadd.f32 %v1492_v40, %v1463_v62  ;;  %v1537_v50 = vmul.f32 %v3693_v34, %v4443_v4  ;;  %v5226_v40 = vld [vmem:[#allocation67_spill] sm:$0xff] }
 0x383   : > { %v1494_v21 = vmul.f32 %v3620_v56, %v1355_v15  ;;  %v1551_v23 = vadd.f32 %v1535_v10, %v1506_v46  ;;  %v1625_v0 = vmul.f32 %v3700_v28, %v1355_v15  ;;  %v1639_v39 = vadd.f32 %v1623_v1, %v1594_v35 }
 0x384   : > { %5222 = vst [vmem:[#allocation53_spill] sm:$0xff] %v4452_v48  ;;  %v1668_v3 = vmul.f32 %v3703_v29, %v4443_v4  ;;  %v1465_v24 = vadd.f32 %v1449_v26, %v1420_v16  ;;  %v1553_v54 = vadd.f32 %v1537_v50, %v1508_v38  ;;  %v1682_v7 = vadd.f32 %v1666_v45, %v1637_v63  ;;  %v5229_v50 = vld [vmem:[#allocation78_spill] sm:$0xff] }
 0x385   : > { %v1756_v41 = vmul.f32 %v3708_v44, %v1355_v15  ;;  %v1596_v48 = vadd.f32 %v1580_v43, %v1551_v23  ;;  %v1259_v62 = vsel %vm1247_vm8, %v1234_v14, %v5224_v32  ;;  %v5225_v34 = vrot.slane %v4349_v53, 7  ;;  %v5227_v43 = vld [vmem:[#allocation68_spill] sm:$0xff]  ;;  %v5228_v32 = vld [vmem:[#allocation77_spill] sm:$0xff] }
 0x386   : > { %v1684_v6 = vadd.f32 %v1668_v3, %v1639_v39  ;;  %v1510_v46 = vadd.f32 %v1494_v21, %v1465_v24  ;;  %v1598_v10 = vadd.f32 %v5226_v40, %v1553_v54  ;;  %v1727_v26 = vadd.f32 %v1711_v51, %v1682_v7  ;;  %v5230_v7 = vld [vmem:[#allocation79_spill] sm:$0xff]  ;;  %v5236_v54 = vld [vmem:[#allocation73_spill] sm:$0xff] }
 0x387   : > { %v1261_v35 = vsel %vm1247_vm8, %v5225_v34, %v1234_v14  ;;  %v4472_v63 = vmul.f32 %v5220_v61, %v1259_v62  ;;  %v1641_v15 = vadd.f32 %v1625_v0, %v1596_v48  ;;  %v1307_v45 = vrot.slane %v4422_v30, 1  ;;  %v5231_v61 = vld [vmem:[#allocation81_spill] sm:$0xff]  ;;  %v5237_v34 = vld [vmem:[#allocation74_spill] sm:$0xff] }
 0x388   : > { %v1729_v1 = vadd.f32 %v5227_v43, %v1684_v6  ;;  %v1394_v16 = vmul.f32 %v3623_v58, %v1261_v35  ;;  %v1555_v38 = vadd.f32 %v5228_v32, %v1510_v46  ;;  %v4479_v23 = vadd.f32 %v5229_v50, %v1598_v10  ;;  %v5238_v50 = vld [vmem:[#allocation88_spill] sm:$0xff] }
 0x389   : > { %v1772_v14 = vadd.f32 %v1756_v41, %v1727_v26  ;;  %v1450_v21 = vmul.f32 %v3593_v42, %v4422_v30  ;;  %v1686_v51 = vadd.f32 %v5230_v7, %v1641_v15  ;;  %v5232_v48 = vrot.slane %v5223_v17, 1  ;;  %v5239_v7 = vld [vmem:[#allocation71_spill] sm:$0xff] }
 0x38a   : > { %v1774_v39 = vadd.f32 %v5231_v61, %v1729_v1  ;;  %v5234_v3 = vrot.slane %v4349_v53, 1  ;;  %v1600_v6 = vadd.f32 %v5236_v54, %v1555_v38  ;;  %v1421_v42 = vadd.f32 %v3632_v60, %v1394_v16 }
 0x38b   : > { %v1332_v0 = vsel %vm5233_vm1, %v1307_v45, %v5232_v48  ;;  %v1731_v46 = vadd.f32 %v5237_v34, %v1686_v51  ;;  %v1507_v17 = vadd.f32 %v4405_v25, %v4221_v55  ;;  %v1536_v40 = vmul.f32 %v3711_v37, %v1261_v35 }
 0x38c   : > { %v1334_v24 = vsel %vm5235_vm2, %v5234_v3, %v1307_v45  ;;  %v1356_v41 = vmul.f32 %v5221_v22, %v1332_v0  ;;  %v1538_v53 = vmul.f32 %v3711_v37, %v4472_v63  ;;  %v1466_v10 = vadd.f32 %v1450_v21, %v1421_v42  ;;  %v5242_v3 = vld [vmem:[#allocation83_spill] sm:$0xff]  ;;  %v5243_v42 = vld [vmem:[#allocation89_spill] sm:$0xff] }
 0x38d   : > { %v1493_v62 = vmul.f32 %v3626_v59, %v1334_v24  ;;  %v1581_v22 = vmul.f32 %v3668_v12, %v4422_v30  ;;  %v1776_v43 = vadd.f32 %v4263_v20, %v1731_v46  ;;  %v1552_v1 = vadd.f32 %v1536_v40, %v1507_v17  ;;  %v5244_v46 = vld [vmem:[#allocation91_spill] sm:$0xff] }
 0x38e   : > { %v1495_v26 = vmul.f32 %v3626_v59, %v1356_v41  ;;  %v1624_v45 = vmul.f32 %v3735_v2, %v1334_v24  ;;  %v1626_v16 = vmul.f32 %v3735_v2, %v1356_v41  ;;  %v1638_v32 = vadd.f32 %v4411_v36, %v4230_v27 }
 0x38f   : > { %v1509_v15 = vadd.f32 %v1493_v62, %v1464_v9  ;;  %v1667_v37 = vmul.f32 %v3758_v57, %v1261_v35  ;;  %v1597_v38 = vadd.f32 %v1581_v22, %v1552_v1  ;;  %v1669_v12 = vmul.f32 %v3758_v57, %v4472_v63 }
 0x390   : > { %v1511_v55 = vadd.f32 %v1495_v26, %v1466_v10  ;;  %v1640_v9 = vadd.f32 %v1624_v45, %v4424_v8  ;;  %v1712_v20 = vmul.f32 %v3671_v18, %v4422_v30  ;;  %v4520_v48 = vmul.f32 %v3761_v5, %v1334_v24  ;;  %v5241_v8 = vld [vmem:[#allocation82_spill] sm:$0xff]  ;;  %v5245_v24 = vld [vmem:[#allocation72_spill] sm:$0xff]  ;;  %v5247_v26 = vld [vmem:[#allocation75_spill] sm:$0xff] }
 0x391   : > { %v1554_v25 = vadd.f32 %v1538_v53, %v1509_v15  ;;  %v1683_v61 = vadd.f32 %v1667_v37, %v1638_v32  ;;  %v1642_v27 = vadd.f32 %v1626_v16, %v1597_v38  ;;  %v1757_v35 = vmul.f32 %v3761_v5, %v1356_v41  ;;  %v5246_v53 = vld [vmem:[#allocation55_spill] sm:$0xff] }
 0x392   : > { %v1556_v21 = vadd.f32 %v5238_v50, %v1511_v55  ;;  %v1685_v36 = vadd.f32 %v1669_v12, %v1640_v9  ;;  %v876_v0 = vadd.f32 %v5241_v8, %v3579_v33  ;;  %v1395_v34 = vmul.f32 %v3602_v47, %v4443_v4  ;;  %v5248_v4 = vld [vmem:[#allocation84_spill] sm:$0xff]  ;;  %v5252_v50 = vld [vmem:[#allocation101_spill] sm:$0xff] }
 0x393   : > { %v1599_v51 = vadd.f32 %v5239_v7, %v1554_v25  ;;  %v1728_v62 = vadd.f32 %v1712_v20, %v1683_v61  ;;  %v1687_v17 = vadd.f32 %v5244_v46, %v1642_v27  ;;  %v1496_v41 = vmul.f32 %v3620_v56, %v5247_v26  ;;  %v5249_v55 = vld [vmem:[#allocation92_spill] sm:$0xff]  ;;  %v5250_v56 = vld [vmem:[#allocation66_spill] sm:$0xff]  ;;  %v5265_v26 = vld [vmem:[#allocation105_spill] sm:$0xff] }
 0x394   : > { %v1601_v54 = vadd.f32 %v5242_v3, %v1556_v21  ;;  %v1730_v40 = vadd.f32 %v5245_v24, %v1685_v36  ;;  %v4532_v10 = vmul.f32 %v5246_v53, %v876_v0  ;;  %v1422_v22 = vadd.f32 %v3611_v49, %v1395_v34  ;;  %v5251_v20 = vld [vmem:[#allocation112_spill] sm:$0xff]  ;;  %v5259_v3 = vld [vmem:[#allocation47_spill] sm:$0xff]  ;;  %v5261_v46 = vld [vmem:[#allocation86_spill] sm:$0xff] }
 0x395   : > { %v1644_v30 = vadd.f32 %v5243_v42, %v1599_v51  ;;  %v1773_v15 = vadd.f32 %v1757_v35, %v1728_v62  ;;  %v1631_v1 = vmul.f32 %v3700_v28, %v4281_v11  ;;  %v1645_v45 = vadd.f32 %v4257_v31, %v1600_v6  ;;  %v5256_v51 = vld [vmem:[#allocation56_spill] sm:$0xff]  ;;  %v5258_v35 = vld [vmem:[#allocation107_spill] sm:$0xff]  ;;  %v5260_v42 = vld [vmem:[#allocation85_spill] sm:$0xff] }
 0x396   : > { %v1732_v16 = vadd.f32 %v5248_v4, %v1687_v17  ;;  %v1775_v25 = vadd.f32 %v5249_v55, %v1730_v40  ;;  %v1243_v32 = vrot.slane %v4532_v10, 7  ;;  %v1316_v37 = vrot.slane %v4532_v10, 1  ;;  %v5266_v4 = vld [vmem:[#allocation114_spill] sm:$0xff]  ;;  %v5267_v55 = vld [vmem:[#allocation48_spill] sm:$0xff] }
 0x397   : > { %v4545_v38 = vmul.f32 %v1773_v15, %v1772_v14  ;;  %v1467_v9 = vadd.f32 %v5250_v56, %v1422_v22  ;;  %v1690_v12 = vadd.f32 %v4290_v52, %v1645_v45  ;;  %v1721_v11 = vmul.f32 %v3665_v13, %v4532_v10 }
 0x398   : > { %v1777_v31 = vadd.f32 %v5251_v20, %v1732_v16  ;;  %v4552_v6 = vmul.f32 %v1775_v25, %v1774_v39  ;;  %v5253_v21 = vrot.slane %v5252_v50, 7  ;;  %v5254_v14 = vrot.slane %v5252_v50, 1  ;;  %v5257_v39 = vld [vmem:[#allocation58_spill] sm:$0xff] }
 0x399   : > { %v1512_v36 = vadd.f32 %v1496_v41, %v1467_v9  ;;  %v1735_v8 = vadd.f32 %v5258_v35, %v1690_v12  ;;  %v878_v62 = vadd.f32 %v5260_v42, %v5259_v3  ;;  %v1396_v34 = vmul.f32 %v3623_v58, %v4472_v63  ;;  %v5272_v20 = vld [vmem:[#allocation110_spill] sm:$0xff]  ;;  %v5276_v35 = vld [vmem:[#allocation115_spill] sm:$0xff]  ;;  %v5277_v42 = vld [vmem:[#allocation100_spill] sm:$0xff] }
 0x39a   : > { %v1250_v7 = vsel %vm1247_vm8, %v5253_v21, %v1243_v32  ;;  %v1323_v52 = vsel %vm5255_vm3, %v5254_v14, %v1316_v37  ;;  %v4571_v0 = vmul.f32 %v1777_v31, %v1776_v43  ;;  %v1497_v17 = vmul.f32 %v3626_v59, %v5261_v46  ;;  %v5273_v50 = vld [vmem:[#allocation106_spill] sm:$0xff] }
 0x39b   : > { %v1292_v61 = vmul.f32 %v5256_v51, %v1250_v7  ;;  %v1363_v27 = vmul.f32 %v5257_v39, %v1323_v52  ;;  %v5262_v24 = vand.u32 15, %v3556_v19  ;;  %v1557_v41 = vadd.f32 %v5265_v26, %v1512_v36  ;;  %v5274_v14 = vld [vmem:[#allocation70_spill] sm:$0xff]  ;;  %v5282_v26 = vld [vmem:[#allocation104_spill] sm:$0xff] }
 0x39c   : > { %v2208_v63 = vpack.c.bf16 %v4571_v0, %v4552_v6  ;;  %v4592_v45 = vmul.f32 %v5246_v53, %v878_v62  ;;  %v1423_v59 = vadd.f32 %v3632_v60, %v1396_v34  ;;  %v1632_v16 = vmul.f32 %v3735_v2, %v5266_v4  ;;  %v5278_v62 = vld [vmem:[#allocation102_spill] sm:$0xff]  ;;  %v5283_v4 = vld [vmem:[#allocation113_spill] sm:$0xff] }
 0x39d   : > { %vm4581_vm4 = vcmp.ne.s32.totalorder %v5262_v24, 0  ;;  %v1633_v43 = vmul.f32 %v3700_v28, %v1363_v27  ;;  %v1676_v15 = vmul.f32 %v3703_v29, %v1292_v61  ;;  %v1764_v22 = vmul.f32 %v3708_v44, %v1363_v27  ;;  %v5271_v28 = vld [vmem:[#allocation99_spill] sm:$0xff] }
 0x39e   : > { %v5268_v25 = vand.u32 15, %v5267_v55  ;;  %v1602_v9 = vadd.f32 %v5271_v28, %v1557_v41  ;;  %v1646_v31 = vadd.f32 %v5272_v20, %v1601_v54  ;;  %v1688_v53 = vadd.f32 %v5273_v50, %v4479_v23  ;;  %v5275_v61 = vld [vmem:[#allocation111_spill] sm:$0xff]  ;;  %2220 = vst [vmem:[%s4611_s4 + $0x8] sm:$0xff] %v2208_v63  }
 0x39f   : > { %v1780_v12 = vadd.f32 %v1764_v22, %v1735_v8  ;;  %v1244_v21 = vrot.slane %v4592_v45, 7  ;;  %v1317_v7 = vrot.slane %v4592_v45, 1  ;;  %v1468_v52 = vadd.f32 %v5274_v14, %v1423_v59 }
 0x3a0   : > { %vm4599_vm5 = vcmp.ne.s32.totalorder %v5268_v25, 15  ;;  %v1689_v27 = vadd.f32 %v5275_v61, %v1644_v30  ;;  %v1647_v36 = vadd.f32 %v1631_v1, %v1602_v9  ;;  %v1691_v8 = vadd.f32 %v5276_v35, %v1646_v31  ;;  %v5284_v25 = vld [vmem:[#allocation109_spill] sm:$0xff]  ;;  %v5285_v9 = vld [vmem:[#allocation108_spill] sm:$0xff] }
 0x3a1   : > { %v1722_v54 = vmul.f32 %v3671_v18, %v4592_v45  ;;  %v1733_v23 = vadd.f32 %v5277_v42, %v1688_v53  ;;  %v5279_v34 = vrot.slane %v5278_v62, 7  ;;  %v5280_v30 = vrot.slane %v5278_v62, 1  ;;  %v5286_v31 = vld [vmem:[#allocation116_spill] sm:$0xff]  ;;  %v5287_v53 = vld [vmem:[#allocation87_spill] sm:$0xff] }
 0x3a2   : > { %v1513_v1 = vadd.f32 %v1497_v17, %v1468_v52  ;;  %v1734_v41 = vadd.f32 %v5282_v26, %v1689_v27  ;;  %v1692_v22 = vadd.f32 %v1676_v15, %v1647_v36  ;;  %v1736_v55 = vadd.f32 %v5283_v4, %v1691_v8  ;;  %v5288_v52 = vld [vmem:[#allocation103_spill] sm:$0xff] }
 0x3a3   : > { %v1251_v46 = vsel %vm1247_vm8, %v5279_v34, %v1244_v21  ;;  %v1324_v24 = vsel %vm5281_vm6, %v5280_v30, %v1317_v7  ;;  %v1778_v20 = vadd.f32 %v5285_v9, %v1733_v23  ;;  %v880_v14 = vadd.f32 %v5287_v53, %v3579_v33  ;;  %v5289_v36 = vld [vmem:[#allocation59_spill] sm:$0xff]  ;;  %v5293_v34 = vld [vmem:[#allocation80_spill] sm:$0xff] }
 0x3a4   : > { %v1293_v63 = vmul.f32 %v5256_v51, %v1251_v46  ;;  %v1364_v59 = vmul.f32 %v5257_v39, %v1324_v24  ;;  %v1558_v28 = vadd.f32 %v5284_v25, %v1513_v1  ;;  %v1779_v50 = vadd.f32 %v5286_v31, %v1734_v41  ;;  %v5290_v8 = vld [vmem:[#allocation51_spill] sm:$0xff] }
 0x3a5   : > { %v1737_v61 = vadd.f32 %v1721_v11, %v1692_v22  ;;  %v1005_v35 = vmul.f32 %v5289_v36, %v880_v14  ;;  %v1649_v42 = vadd.f32 %v1633_v43, %v5290_v8  ;;  %v5291_v62 = vmov 0.0   ;;  %v5292_v11 = vld [vmem:[#allocation90_spill] sm:$0xff] }
 0x3a6   : > { %v1634_v17 = vmul.f32 %v3735_v2, %v1364_v59  ;;  %v1677_v15 = vmul.f32 %v3758_v57, %v1293_v63  ;;  %v1765_v51 = vmul.f32 %v3761_v5, %v1364_v59  ;;  %v1603_v39 = vadd.f32 %v5288_v52, %v1558_v28 }
 0x3a7   : > { %v4641_v27 = vmul.f32 %v1779_v50, %v1778_v20  ;;  %v2154_v33 = vsel %vm4581_vm4, 1.0, %v5291_v62  ;;  %v882_v2 = vadd.f32 %v5292_v11, %v5259_v3  ;;  %v1245_v24 = vrot.slane %v1005_v35, 7 }
 0x3a8   : > { %v1781_v23 = vadd.f32 %v1765_v51, %v1736_v55  ;;  %v1650_v46 = vadd.f32 %v1634_v17, %v5293_v34  ;;  %v1648_v30 = vadd.f32 %v1632_v16, %v1603_v39  ;;  %v1318_v1 = vrot.slane %v1005_v35, 1  ;;  %v5294_v16 = vld [vmem:[#allocation57_spill] sm:$0xff] }
 0x3a9   : > { %v1723_v26 = vmul.f32 %v3665_v13, %v1005_v35  ;;  %v2165_v43 = vsel %vm4599_vm5, 1.0, %v5291_v62  ;;  %v1006_v22 = vmul.f32 %v5289_v36, %v882_v2  ;;  %v1248_v3 = vsel %vm1247_vm8, %v1243_v32, %v1245_v24  ;;  %v5304_v36 = vld [vmem:[#allocation61_spill] sm:$0xff]  ;;  %v5305_v62 = vld [vmem:[#allocation64_spill] sm:$0xff] }
 0x3aa   : > { %v4652_v41 = vmul.f32 %v1781_v23, %v1780_v12  ;;  %v1693_v40 = vadd.f32 %v1677_v15, %v1648_v30  ;;  %v5295_v63 = vrot.slane %v5294_v16, 7  ;;  %v1321_v56 = vsel %vm5296_vm7, %v1316_v37, %v1318_v1  ;;  %v5299_v15 = vld [vmem:[#allocation60_spill] sm:$0xff]  ;;  %v5307_v30 = vld [vmem:[#allocation62_spill] sm:$0xff] }
 0x3ab   : > { %v5297_v4 = vrot.slane %v5294_v16, 1  ;;  %v1678_v32 = vmul.f32 %v3703_v29, %v1248_v3  ;;  %v1766_v9 = vmul.f32 %v3708_v44, %v1321_v56  ;;  %v1246_v20 = vrot.slane %v1006_v22, 7  ;;  %v5311_v3 = vld [vmem:[#allocation96_spill] sm:$0xff]  ;;  %v5313_v56 = vld [vmem:[#allocation94_spill] sm:$0xff] }
 0x3ac   : > { %v1270_v13 = vsel %vm1247_vm8, %v1245_v24, %v5295_v63  ;;  %v2213_v12 = vpack.c.bf16 %v4652_v41, %v4641_v27  ;;  %v1738_v25 = vadd.f32 %v1722_v54, %v1693_v40  ;;  %v1319_v37 = vrot.slane %v1006_v22, 1  ;;  %v5310_v40 = vld [vmem:[#allocation97_spill] sm:$0xff]  ;;  %v5312_v63 = vld [vmem:[#allocation50_spill] sm:$0xff] }
 0x3ad   : > { %v1272_v59 = vmul.f32 %v2154_v33, %v1270_v13  ;;  %v1343_v55 = vsel %vm5298_vm11, %v1318_v1, %v5297_v4  ;;  %v1694_v31 = vadd.f32 %v1678_v32, %v1649_v42  ;;  %v1724_v50 = vmul.f32 %v3671_v18, %v1006_v22 }
 0x3ae   : > { %v1367_v28 = vmul.f32 %v2165_v43, %v1343_v55  ;;  %2221 = vst [vmem:[%s4611_s4 + $0x10] sm:$0xff] %v2213_v12   ;;  %v1782_v14 = vadd.f32 %v1766_v9, %v1737_v61  ;;  %v1249_v17 = vsel %vm1247_vm8, %v1244_v21, %v1246_v20  ;;  %v5300_v29 = vrot.slane %v5299_v15, 7  ;;  %v5315_v55 = vld [vmem:[#allocation98_spill] sm:$0xff]  ;;  %v5317_v9 = vld [vmem:[#allocation117_spill] sm:$0xff] }
 0x3af   : > { %v1383_v10 = vmul.f32 %v3602_v47, %v1272_v59  ;;  %v1739_v52 = vadd.f32 %v1723_v26, %v1694_v31  ;;  %v1322_v18 = vsel %vm5301_vm12, %v1317_v7, %v1319_v37  ;;  %v1679_v21 = vmul.f32 %v3758_v57, %v1249_v17  ;;  %v5306_v57 = vld [vmem:[#allocation95_spill] sm:$0xff]  ;;  %v5308_v26 = vld [vmem:[#allocation93_spill] sm:$0xff]  ;;  %v5314_v59 = vld [vmem:[#allocation76_spill] sm:$0xff] }
 0x3b0   : > { %v1768_v53 = vmul.f32 %v3708_v44, %v1367_v28  ;;  %v1271_v54 = vsel %vm1247_vm8, %v1246_v20, %v5300_v29  ;;  %v5302_v44 = vrot.slane %v5299_v15, 1  ;;  %v1767_v39 = vmul.f32 %v3761_v5, %v1322_v18 }
 0x3b1   : > { %v1410_v51 = vadd.f32 %v3611_v49, %v1383_v10  ;;  %v1273_v47 = vmul.f32 %v2154_v33, %v1271_v54  ;;  %v1695_v23 = vadd.f32 %v1679_v21, %v1650_v46  ;;  %v5318_v10 = vld [vmem:[#allocation52_spill] sm:$0xff] }
 0x3b2   : > { %v1344_v61 = vsel %vm5303_vm9, %v1319_v37, %v5302_v44  ;;  %v1784_v8 = vadd.f32 %v1768_v53, %v1739_v52  ;;  %v1783_v45 = vadd.f32 %v1767_v39, %v1738_v25  ;;  %v5316_v25 = vld [vmem:[#allocation53_spill] sm:$0xff] }
 0x3b3   : > { %v1455_v35 = vadd.f32 %v5304_v36, %v1410_v51  ;;  %v1368_v49 = vmul.f32 %v2165_v43, %v1344_v61  ;;  %v1384_v42 = vmul.f32 %v3623_v58, %v1273_v47  ;;  %v1740_v11 = vadd.f32 %v1724_v50, %v1695_v23  ;;  %v5309_v58 = vld [vmem:[#allocation65_spill] sm:$0xff] }
 0x3b4   : > { %v4704_v2 = vmul.f32 %v1783_v45, %v1782_v14  ;;  %v2916_v14 = vmov (!%p2174_p9), 0.0  }
 0x3b5   : > { %v1500_v33 = vadd.f32 %v5305_v62, %v1455_v35  ;;  %v1411_v7 = vadd.f32 %v3632_v60, %v1384_v42  ;;  %v1769_v19 = vmul.f32 %v3761_v5, %v1368_v49  ;;  %1838 = vst [vmem:[%s4729_s25] sm:$0x1] (!%p2174_p9), %v2916_v14 }
 0x3b7   : > { %v1545_v34 = vadd.f32 %v5306_v57, %v1500_v33  ;;  %v1456_v24 = vadd.f32 %v5307_v30, %v1411_v7  ;;  %v1785_v1 = vadd.f32 %v1769_v19, %v1740_v11 }
 0x3b9   : > { %v1590_v43 = vadd.f32 %v5308_v26, %v1545_v34  ;;  %v1501_v46 = vadd.f32 %v5309_v58, %v1456_v24  ;;  %v4710_v22 = vmul.f32 %v1785_v1, %v1784_v8 }
 0x3bb   : > { %v1635_v60 = vadd.f32 %v5310_v40, %v1590_v43  ;;  %v1546_v5 = vadd.f32 %v5311_v3, %v1501_v46  ;;  %v2218_v16 = vpack.c.bf16 %v4710_v22, %v4704_v2 }
 0x3bd   : > { %v1680_v13 = vadd.f32 %v5312_v63, %v1635_v60  ;;  %v1591_v12 = vadd.f32 %v5313_v56, %v1546_v5  ;;  %2222 = vst [vmem:[%s4611_s4 + $0x18] sm:$0xff] %v2218_v16  }
 0x3bf   : > { %v1725_v4 = vadd.f32 %v5314_v59, %v1680_v13  ;;  %v1636_v32 = vadd.f32 %v5315_v55, %v1591_v12 }
 0x3c1   : > { %v1770_v28 = vadd.f32 %v5316_v25, %v1725_v4  ;;  %v1681_v20 = vadd.f32 %v5317_v9, %v1636_v32 }
 0x3c3   : > { %v1726_v31 = vadd.f32 %v5318_v10, %v1681_v20 }
 0x3c5   : > { %v1771_v37 = vadd.f32 %v4520_v48, %v1726_v31  ;;  %1837 = sbr.rel (%p2174_p9) target bundleno = 972 (0x3cc), region = 64 }
 0x3c7   : > { %v1786_v50 = vmul.f32 %v1771_v37, %v1770_v28 }
 0x3c9   : > { %v2203_v53 = vpack.c.bf16 %v4545_v38, %v1786_v50 }
 0x3cb   : > { %2204 = vst [vmem:[%s4611_s4] sm:$0xff] %v2203_v53  }
 0x3cc PF: > { %s5319_s12 = sld [smem:[#allocation31_spill]]  ;;  %s5320_s5 = sld [smem:[#allocation32_spill]]  ;;  %v1840_v48 = vadd.f32 %v4545_v38, %v1786_v50 }
 0x3cd   : > { %s5322_s21 = sld [smem:[#allocation35_spill]]  ;;  %s1875_s13 = sshll.u32 %s4611_s4, 4  ;;  %s4738_s13 = int_to_ptr.vmem [resolvable:$true] %s1875_s13 }
 0x3ce   : > { %v1841_v17 = vadd.f32 %v1840_v48, %v4552_v6  ;;  %s5323_s22 = sld [smem:[#allocation122_spill]]  ;;  %s4748_s0 = scalar_lea.sflag [#allocation4], %s421_s8 }
 0x3cf   : > { %s2663_s6 = scalar_lea.vmem %s4738_s13, 512  ;;  %s2917_s27 = smov [#allocation11]  }
 0x3d0   : > { %v1842_v15 = vadd.f32 %v1841_v17, %v4571_v0  ;;  %p2664_p0 = scmp.ne.s32.totalorder %s4738_s13, %s2663_s6  ;;  %s2667_s29 = sshll.u32 %s2917_s27, 4  ;;  %s2668_s29 = int_to_ptr.vmem [resolvable:$false] %s2667_s29 }
 0x3d1   : > { %s2669_s24 = scalar_lea.vmem %s2668_s29, 1024  ;;  %p2670_p6 = scmp.lt.s32.totalorder %s4738_s13, %s2668_s29 }
 0x3d2   : > { %s2176_s20 = sshll.u32 %s5319_s12, 3  ;;  %s2177_s1 = sshll.u32 %s5320_s5, 5 }
 0x3d3   : > { %s1872_s10 = sadd.s32 %s2177_s1, %s2176_s20  ;;  %p5325_p2 = scmp.ne.s32.totalorder %s5322_s21, 0 }
 0x3d4   : > { %s2178_s30 = sshll.u32 %s1872_s10, 6  ;;  %s5324_s17 = smov %s5323_s22 }
 0x3d5   : > { %s4744_s9 = scalar_lea.hbm %s5323_s22, %s2178_s30  ;;  %p2665_p13 = pnand %p2664_p0, %p5325_p2 }
 0x3d6   : > { %p2671_p12 = scmp.lt.s32.totalorder %s2669_s24, %s2663_s6 }
 0x3d7   : > { %p2666_p10 = pneg %p2665_p13 }
 0x3d8   : > { %p2672_p8 = por %p2671_p12, %p2670_p6 }
 0x3da   : > { %p2673_p4 = pnand %p2672_p8, %p2666_p10 }
 0x3dc   : > { %2676 = shalt.err (!%p2673_p4)
}
 0x3dd   : > { %s2677_s8 = scalar_lea.hbm %s4744_s9, 512  ;;  %s2681_s3 = scalar_lea.hbm %s5324_s17, 4096 }
 0x3de   : > { %p2678_p5 = scmp.ne.s32.totalorder %s4744_s9, %s2677_s8  ;;  %p2682_p11 = scmp.lt.u32.totalorder %s4744_s9, %s5324_s17 }
 0x3df   : > { %p2683_p1 = scmp.lt.u32.totalorder %s2681_s3, %s2677_s8  ;;  %p2685_p0 = scmp.lt.u32.totalorder %s2677_s8, %s4744_s9 }
 0x3e0   : > { %p2679_p7 = pnand %p2678_p5, %p5325_p2 }
 0x3e1   : > { %p2684_p9 = por %p2683_p1, %p2682_p11 }
 0x3e2   : > { %p2680_p3 = pneg %p2679_p7 }
 0x3e3   : > { %p2686_p13 = por %p2685_p0, %p2684_p9 }
 0x3e5   : > { %p2687_p10 = pnand %p2686_p13, %p2680_p3 }
 0x3e7   : > { %2690 = shalt.err (!%p2687_p10)
}
 0x3e8   : > { %s2918_s10 = smov 64   ;;  %s2919_s30 = smov 4   ;;  %v1843_v38 = vadd.f32 %v1842_v15, %v4641_v27  ;;  %v1839_v44 = vld [vmem:[%s4729_s25] sm:$0x1] }
 0x3e9   : > { %2254 = dma.vmem_to_hbm [thread:$0]  (%p5325_p2), %s4738_s13, 512, %s4744_s9, %s4748_s0, %s2918_s10, %s2918_s10, %s2919_s30  }
 0x3ea   : > { %v1844_v6 = vadd.f32 %v1843_v38, %v4652_v41  ;;  %s5327_s18 = sld [smem:[#allocation37_spill]]  ;;  %s2179_s22 = sshll.u32 %s5320_s5, 4 }
 0x3eb   : > { %s1891_s21 = sshll.u32 %s4729_s25, 4  ;;  %s5328_s0 = sld [smem:[#allocation123_spill]]  ;;  %s4784_s21 = int_to_ptr.vmem [resolvable:$true] %s1891_s21 }
 0x3ec   : > { %v1845_v0 = vadd.f32 %v1844_v6, %v4704_v2  ;;  %s1861_s27 = scalar_lea.sflag [#allocation13], %s428_s14  ;;  %s2691_s29 = scalar_lea.vmem %s4784_s21, 16 }
 0x3ed   : > { %p2692_p2 = scmp.ne.s32.totalorder %s4784_s21, %s2691_s29  ;;  %s2920_s5 = smov [#allocation12]  }
 0x3ee   : > { %v1846_v29 = vadd.f32 %v1845_v0, %v4710_v22  ;;  %s2695_s24 = sshll.u32 %s2920_s5, 4  ;;  %s2696_s24 = int_to_ptr.vmem [resolvable:$false] %s2695_s24 }
 0x3ef   : > { %s2697_s8 = scalar_lea.vmem %s2696_s24, 32  ;;  %p2698_p4 = scmp.lt.s32.totalorder %s4784_s21, %s2696_s24 }
 0x3f0   : > { %v1847_v54 = vrot.slane %v1846_v29, 4  ;;  %p5329_p6 = scmp.ne.s32.totalorder %s5327_s18, 0  ;;  %p2699_p5 = scmp.lt.s32.totalorder %s2697_s8, %s2691_s29 }
 0x3f1   : > { %s4782_s6 = scalar_lea.hbm %s5328_s0, %s2179_s22 }
 0x3f2   : > { %v1848_v51 = vadd.f32 %v1847_v54, %v1846_v29  ;;  %p2693_p12 = pnand %p2692_p2, %p5329_p6  ;;  %p2700_p7 = por %p2699_p5, %p2698_p4 }
 0x3f4   : > { %v1849_v52 = vrot.slane %v1848_v51, 2  ;;  %p2694_p8 = pneg %p2693_p12 }
 0x3f6   : > { %v1850_v47 = vadd.f32 %v1849_v52, %v1848_v51  ;;  %p2701_p3 = pnand %p2700_p7, %p2694_p8 }
 0x3f8   : > { %v1851_v18 = vrot.slane %v1850_v47, 1 }
 0x3fa   : > { %v1852_v61 = vadd.f32 %v1851_v18, %v1850_v47 }
 0x3fc   : > { %v1853_v21 = vadd.f32 %v1852_v61, %v1839_v44 }
 0x3fe   : > { %1854 = vst [vmem:[%s4729_s25] sm:$0x1] %v1853_v21 }
 0x3ff   : > { %2704 = shalt.err (!%p2701_p3)
}
 0x400   : > { %s2705_s14 = scalar_lea.hbm %s4782_s6, 16  ;;  %s2709_s12 = scalar_lea.hbm %s5328_s0, 32 }
 0x401   : > { %p2706_p11 = scmp.ne.s32.totalorder %s4782_s6, %s2705_s14  ;;  %p2710_p0 = scmp.lt.u32.totalorder %s4782_s6, %s5328_s0 }
 0x402   : > { %p2711_p13 = scmp.lt.u32.totalorder %s2709_s12, %s2705_s14  ;;  %p2713_p2 = scmp.lt.u32.totalorder %s2705_s14, %s4782_s6 }
 0x403   : > { %p2707_p1 = pnand %p2706_p11, %p5329_p6 }
 0x404   : > { %p2712_p10 = por %p2711_p13, %p2710_p0 }
 0x405   : > { %p2708_p9 = pneg %p2707_p1 }
 0x406   : > { %p2714_p12 = por %p2713_p2, %p2712_p10 }
 0x408   : > { %p2715_p8 = pnand %p2714_p12, %p2708_p9 }
 0x40a   : > { %2718 = shalt.err (!%p2715_p8)
}
 0x40b   : > { %2255 = dma.vmem_to_hbm [thread:$0]  (%p5329_p6), %s4784_s21, 16, %s4782_s6, %s1861_s27  }
 0x40c PF: > { %s5330_s1 = sld [smem:[#allocation22_spill]]  ;;  %s5331_s10 = sld [smem:[#allocation36_spill]] }
 0x40d   : > { %p2287_p4 = scmp.ge.s32.totalorder %s2901_s16, 2 }
 0x412   : > { %s1903_s30 = sand.u32 1, %s5330_s1   ;;  %p5332_p5 = scmp.ne.s32.totalorder %s5331_s10, 0 }
 0x413   : > { %s1904_s28 = scalar_lea.sflag [#allocation4], %s1903_s30 }
 0x414   : > { %p2276_p7 = pnand %p2287_p4, %p5332_p5 }
 0x416   : > { %2816 = dma.done.wait (!%p2276_p7), %s1904_s28, 512  }
 0x417   : > { %2818 = vsyncadd (!%p2276_p7), %s1904_s28, 4294966784  ;;  %s5333_s22 = sld [smem:[#allocation20_spill]]  ;;  %s5334_s13 = sld [smem:[#allocation38_spill]] }
 0x41d   : > { %s1912_s9 = sand.u32 1, %s5333_s22   ;;  %p5335_p3 = scmp.ne.s32.totalorder %s5334_s13, 0 }
 0x41e   : > { %s1913_s18 = scalar_lea.sflag [#allocation13], %s1912_s9 }
 0x41f   : > { %p2279_p11 = pnand %p2287_p4, %p5335_p3 }
 0x421   : > { %2820 = dma.done.wait (!%p2279_p11), %s1913_s18, 16  }
 0x422   : > { %2822 = vsyncadd (!%p2279_p11), %s1913_s18, 4294967280  ;;  %s30_s16 = sadd.s32 1, %s2901_s16   ;;  %s5338_s21 = sld [smem:[#allocation21_spill]] }
 0x423   : > { %p4818_p6 = scmp.ge.s32.totalorder %s30_s16, 10   ;;  %s5339_s27 = sld [smem:[#allocation45_spill]] }
 0x424   : > { %s5340_s24 = sld [smem:[#allocation23_spill]]  ;;  %s5341_s29 = sld [smem:[#allocation44_spill]] }
 0x425   : > { %s5342_s5 = sld [smem:[#allocation25_spill]]  ;;  %s5343_s28 = sld [smem:[#allocation26_spill]] }
 0x426   : > { %s5344_s30 = sld [smem:[#allocation27_spill]]  ;;  %s5345_s8 = sld [smem:[#allocation28_spill]] }
 0x427   : > { %s5346_s14 = sld [smem:[#allocation43_spill]]  ;;  %s5347_s9 = sld [smem:[#allocation30_spill]] }
 0x428   : > { %s5348_s4 = sld [smem:[#allocation46_spill]]  ;;  %s5349_s12 = sld [smem:[#allocation33_spill]] }
 0x429   : > { %s5350_s22 = smov %s2833_s23  ;;  %s5351_s3 = sld [smem:[#allocation40_spill]] }
 0x42a   : > { %s5352_s23 = smov %s5339_s27  ;;  %s5353_s20 = sld [smem:[#allocation41_spill]] }
 0x42b   : > { %s5354_s25 = smov %s2845_s26  ;;  %s5355_s26 = smov %s5341_s29 }
 0x42c   : > { %s5356_s27 = smov %s5342_s5  ;;  %s5357_s29 = smov %s3327_s7 }
 0x42d   : > { %s5358_s7 = smov %s5345_s8  ;;  %s5359_s8 = smov %s5346_s14 }
 0x42e   : > { %s5360_s10 = smov %s2881_s11  ;;  %s5361_s11 = smov %s5348_s4 }
 0x42f   : > { %s5362_s13 = smov %s2897_s15  ;;  %s5363_s14 = smov %s5351_s3 }
 0x430   : > { %s5364_s15 = smov %s5353_s20  ;;  %29 = sbr.rel (!%p4818_p6) target bundleno = 25 (0x19), region = 148 }
 0x437   :  { %1917 = vsyncpa [#allocation3], 1 }
 0x438   :  { %1919 = vsyncpa [#allocation3 + $0x1], 1 }
 0x439   :  { %1920 = vsyncpa [#allocation6], 1 }
 0x43a   :  { %1922 = vsyncpa [#allocation6 + $0x1], 1 }
 0x43b   :  { %1923 = vsyncpa [#allocation9], 1 }
 0x43c   :  { %1924 = vsyncpa [#allocation4], 1 }
 0x43d   :  { %1926 = vsyncpa [#allocation4 + $0x1], 1 }
 0x43e   :  { %1927 = vsyncpa [#allocation13], 1 }
 0x43f   :  { %1929 = vsyncpa [#allocation13 + $0x1], 1 }

</bundles_post_ra>
